<compile_context>
chip_gen: v6e
topology: v6e:2x2x1
jax: 0.10.0
libtpu: 0.0.40
codegen_flags: <defaults>
</compile_context>

<pallas_src>
import math
import functools

import jax
import jax.numpy as jnp
import numpy as np
from jax.experimental import pallas as pl
from jax.experimental.pallas import tpu as pltpu

SQRT_HALF = math.sqrt(0.5)


def _silu(x):
    return x * jax.nn.sigmoid(x)


# ---------------------------------------------------------------------------
# Single fused kernel: one grid step == one batch element.
# ---------------------------------------------------------------------------
def fused_forward_kernel(T, C, dilations,
                         x_ref, emb_ref, w_in_ref, b_in_ref,
                         wmlp_ref, bmlp_ref, wt_ref, wconv_ref, wrs_ref,
                         blay_ref, w_out_ref, b_out_ref, o_ref):
    f32, bf16 = jnp.float32, jnp.bfloat16

    def mm(a, w):  # bf16 MXU inputs, f32 accumulation
        return jnp.dot(a.astype(bf16), w, preferred_element_type=f32)

    # ---- input_projection (Conv1d k=1) + ReLU: (T, F) @ (F, C) -------------
    h = jnp.maximum(mm(x_ref[...], w_in_ref[...]) + b_in_ref[...], 0.0)   # (T, C)

    # ---- diffusion embedding MLP: silu(lin(silu(lin(e)))) -------------------
    e = _silu(mm(emb_ref[...], wmlp_ref[0]) + bmlp_ref[0])
    demb = _silu(mm(e, wmlp_ref[1]) + bmlp_ref[1])                         # (1, E)

    t_idx = jax.lax.broadcasted_iota(jnp.int32, (T, C), 0)
    skip_acc = jnp.zeros((T, C), f32)

    # ---- residual stack (unrolled; dilation static per layer) ---------------
    for n, d in enumerate(dilations):
        part_t = mm(demb, wt_ref[n]) + blay_ref[5 * n + 0]                 # (1, C)
        hh = h + part_t                                                    # (T, C)

        # zero-padded shifted taps h[t-d] / h[t+d]: XLU sublane roll + mask,
        # no VMEM scratch, no unaligned loads.
        h_left = jnp.where(t_idx >= d, pltpu.roll(hh, d, axis=0), 0.0)
        h_right = jnp.where(t_idx < T - d, pltpu.roll(hh, T - d, axis=0), 0.0)

        hc_b = hh.astype(bf16)
        hl_b = h_left.astype(bf16)
        hr_b = h_right.astype(bf16)

        def wc(j, _n=n):
            return wconv_ref[6 * _n + j]     # (C, C) bf16, lane-aligned

        # dilated conv as three accumulating MXU dots per gate half
        y_t = (jnp.dot(hl_b, wc(0), preferred_element_type=f32)
               + jnp.dot(hc_b, wc(1), preferred_element_type=f32)
               + jnp.dot(hr_b, wc(2), preferred_element_type=f32)
               + blay_ref[5 * n + 1])
        y_s = (jnp.dot(hl_b, wc(3), preferred_element_type=f32)
               + jnp.dot(hc_b, wc(4), preferred_element_type=f32)
               + jnp.dot(hr_b, wc(5), preferred_element_type=f32)
               + blay_ref[5 * n + 2])
        gate = jnp.tanh(y_t) * jax.nn.sigmoid(y_s)                         # (T, C) f32

        g_b = gate.astype(bf16)
        res = jnp.dot(g_b, wrs_ref[2 * n + 0], preferred_element_type=f32) + blay_ref[5 * n + 3]
        skp = jnp.dot(g_b, wrs_ref[2 * n + 1], preferred_element_type=f32) + blay_ref[5 * n + 4]
        h = (h + res) * SQRT_HALF
        skip_acc = skip_acc + skp

    # 1/sqrt(num_layers) is already folded into the skip weights/biases.
    o_ref[...] = mm(skip_acc, w_out_ref[...]) + b_out_ref[...]


# ----------------------------- parameters -----------------------------------
def build_embedding_table(num_steps, half_dim):
    steps = jnp.arange(num_steps, dtype=jnp.float32)[:, None]
    freqs = (10.0 ** (jnp.arange(half_dim, dtype=jnp.float32) / (half_dim - 1) * 4.0))[None, :]
    table = steps * freqs
    return jnp.concatenate([jnp.sin(table), jnp.cos(table)], axis=1)   # (num_steps, 2*half_dim)


def init_params(key, *, channels, pre_dim, embedding_dim, num_steps, rdcl):
    """Raw f32 parameters in the natural (PyTorch-like, matmul-form) layout."""
    C, Fd, E = channels, pre_dim, embedding_dim
    keys = iter(jax.random.split(key, 24))

    def nrm(shape, fan_in):
        return jax.random.normal(next(keys), shape, jnp.float32) / math.sqrt(fan_in)

    return {
        "emb_table": build_embedding_table(num_steps, E // 2),
        "w_in": nrm((Fd, C), Fd), "b_in": nrm((C,), Fd),
        "w_p1": nrm((E, E), E), "b_p1": nrm((E,), E),
        "w_p2": nrm((E, E), E), "b_p2": nrm((E,), E),
        # per layer: fc_t, dilated conv (taps: left/center/right; N = [tanh|sig]),
        # res_conv, skip_conv
        "w_t": nrm((rdcl, E, C), E), "b_t": nrm((rdcl, C), E),
        "w_conv": nrm((rdcl, 3, C, 2 * C), 3 * C), "b_conv": nrm((rdcl, 2 * C), 3 * C),
        "w_res": nrm((rdcl, C, C), C), "b_res": nrm((rdcl, C), C),
        "w_skip": nrm((rdcl, C, C), C), "b_skip": nrm((rdcl, C), C),
        "w_out": nrm((C, Fd), C), "b_out": nrm((Fd,), C),
    }


def pack_params(raw):
    """Kernel-side layout: bf16 matmul weights, lane-aligned per-tap / per-half
    weight slabs, packed f32 bias slab, 1/sqrt(L) folded into skip weights."""
    L, E, C = raw["w_t"].shape
    Fd = raw["w_in"].shape[0]
    bf16, f32 = jnp.bfloat16, jnp.float32
    inv_sqrt_l = 1.0 / math.sqrt(L)

    wc = raw["w_conv"]                                                # (L, 3, C, 2C)
    # order per layer: [tanh_left, tanh_center, tanh_right, sig_left, sig_center, sig_right]
    wconv = jnp.concatenate([wc[:, :, :, :C], wc[:, :, :, C:]], axis=1)  # (L, 6, C, C)
    wconv = wconv.reshape(L * 6, C, C).astype(bf16)

    wrs = jnp.stack([raw["w_res"], raw["w_skip"] * inv_sqrt_l], axis=1)  # (L, 2, C, C)
    wrs = wrs.reshape(L * 2, C, C).astype(bf16)

    blay = jnp.stack([raw["b_t"],
                      raw["b_conv"][:, :C], raw["b_conv"][:, C:],
                      raw["b_res"], raw["b_skip"] * inv_sqrt_l], axis=1)  # (L, 5, C)
    blay = blay.reshape(L * 5, 1, C).astype(f32)

    return {
        "emb_table": raw["emb_table"].astype(f32),
        "w_in": raw["w_in"].astype(bf16),
        "b_in": raw["b_in"].reshape(1, C).astype(f32),
        "wmlp": jnp.stack([raw["w_p1"], raw["w_p2"]]).astype(bf16),       # (2, E, E)
        "bmlp": jnp.stack([raw["b_p1"], raw["b_p2"]]).reshape(2, 1, E).astype(f32),
        "wt": raw["w_t"].astype(bf16),                                    # (L, E, C)
        "wconv": wconv, "wrs": wrs, "blay": blay,
        "w_out": raw["w_out"].astype(bf16),
        "b_out": raw["b_out"].reshape(1, Fd).astype(f32),
    }


# ----------------------------- wrapper ---------------------------------------
def diff_csdi_forward(packed, x, diffusion_step):
    """x: (B, T, F) float32; diffusion_step: python int step index."""
    B, T, Fd = x.shape
    C = packed["w_in"].shape[1]
    rdcl = packed["wt"].shape[0]
    dilations = tuple(2 ** (n % 4) for n in range(rdcl))
    assert max(dilations) < T, "dilation must be smaller than the sequence length"

    emb = packed["emb_table"][diffusion_step][None, :]                 # (1, E) — glue lookup

    def full(a):
        return pl.BlockSpec(a.shape, lambda b, _nd=a.ndim: (0,) * _nd)

    kern = functools.partial(fused_forward_kernel, T, C, dilations)
    out2d = pl.pallas_call(
        kern,
        grid=(B,),
        out_shape=jax.ShapeDtypeStruct((B * T, Fd), jnp.float32),
        in_specs=[
            pl.BlockSpec((T, Fd), lambda b: (b, 0)),                   # x (per-batch block)
            full(emb),
            full(packed["w_in"]), full(packed["b_in"]),
            full(packed["wmlp"]), full(packed["bmlp"]),
            full(packed["wt"]),
            full(packed["wconv"]), full(packed["wrs"]), full(packed["blay"]),
            full(packed["w_out"]), full(packed["b_out"]),
        ],
        out_specs=pl.BlockSpec((T, Fd), lambda b: (b, 0)),
        compiler_params=pltpu.CompilerParams(
            dimension_semantics=("parallel",)),                        # v7x: 2 TCs share the batch
    )(x.reshape(B * T, Fd), emb,
      packed["w_in"], packed["b_in"], packed["wmlp"], packed["bmlp"],
      packed["wt"], packed["wconv"], packed["wrs"], packed["blay"],
      packed["w_out"], packed["b_out"])
    return out2d.reshape(B, T, Fd)


# ----------------------------- pure-JAX reference ----------------------------
def reference_forward(raw, x, diffusion_step):
    """Mirror of the PyTorch forward. Matmul operands are rounded to bf16
    (with f32 accumulation) to match the kernel's MXU precision; everything
    else is f32."""
    f32 = jnp.float32

    def bf(a):
        return a.astype(jnp.bfloat16).astype(f32)

    B, T, Fd = x.shape
    C = raw["w_in"].shape[1]
    L = raw["w_t"].shape[0]

    h = jnp.maximum(jnp.einsum("btf,fc->btc", bf(x), bf(raw["w_in"])) + raw["b_in"], 0.0)
    e = raw["emb_table"][diffusion_step]
    e = _silu(bf(e) @ bf(raw["w_p1"]) + raw["b_p1"])
    e = _silu(bf(e) @ bf(raw["w_p2"]) + raw["b_p2"])

    skip_sum = jnp.zeros((B, T, C), f32)
    for n in range(L):
        d = 2 ** (n % 4)
        part_t = bf(e) @ bf(raw["w_t"][n]) + raw["b_t"][n]
        hh = h + part_t
        hp = jnp.pad(hh, ((0, 0), (d, d), (0, 0)))
        taps = [hp[:, 0:T], hp[:, d:d + T], hp[:, 2 * d:2 * d + T]]     # left, center, right
        y = sum(jnp.einsum("btc,cd->btd", bf(tap), bf(raw["w_conv"][n, j]))
                for j, tap in enumerate(taps)) + raw["b_conv"][n]
        gate = jnp.tanh(y[..., :C]) * jax.nn.sigmoid(y[..., C:])
        res = jnp.einsum("btc,cd->btd", bf(gate), bf(raw["w_res"][n])) + raw["b_res"][n]
        skp = jnp.einsum("btc,cd->btd", bf(gate), bf(raw["w_skip"][n])) + raw["b_skip"][n]
        h = (h + res) * SQRT_HALF
        skip_sum = skip_sum + skp
    s = skip_sum / math.sqrt(L)
    return jnp.einsum("btc,cf->btf", bf(s), bf(raw["w_out"])) + raw["b_out"]


if __name__ == "__main__":
    B, T = 2, 16
    channels, pre_dim, embedding_dim = 32, 8, 32
    num_steps, rdcl = 50, 2
    diffusion_step = 7

    key = jax.random.PRNGKey(0)
    kx, kp = jax.random.split(key)
    x = jax.random.normal(kx, (B, T, pre_dim), jnp.float32)
    raw = init_params(kp, channels=channels, pre_dim=pre_dim,
                      embedding_dim=embedding_dim, num_steps=num_steps, rdcl=rdcl)
    packed = pack_params(raw)

    out = diff_csdi_forward(packed, x, diffusion_step)
    out = jax.block_until_ready(out)
    assert out.shape == (B, T, pre_dim)

    ref = reference_forward(raw, x, diffusion_step)
    np.testing.assert_allclose(np.asarray(out), np.asarray(ref), rtol=1e-2, atol=1e-2)

    print("KERNEL_OK")
</pallas_src>

<mosaic_0001>
module attributes {stable_mosaic.version = 11 : i64} {
  func.func @fused_forward_kernel(%arg0: i32, %arg1: memref<16x8xf32, #tpu.memory_space<vmem>>, %arg2: memref<1x32xf32, #tpu.memory_space<vmem>>, %arg3: memref<8x32xbf16, #tpu.memory_space<vmem>>, %arg4: memref<1x32xf32, #tpu.memory_space<vmem>>, %arg5: memref<2x32x32xbf16, #tpu.memory_space<vmem>>, %arg6: memref<2x1x32xf32, #tpu.memory_space<vmem>>, %arg7: memref<2x32x32xbf16, #tpu.memory_space<vmem>>, %arg8: memref<12x32x32xbf16, #tpu.memory_space<vmem>>, %arg9: memref<4x32x32xbf16, #tpu.memory_space<vmem>>, %arg10: memref<10x1x32xf32, #tpu.memory_space<vmem>>, %arg11: memref<32x8xbf16, #tpu.memory_space<vmem>>, %arg12: memref<1x8xf32, #tpu.memory_space<vmem>>, %arg13: memref<16x8xf32, #tpu.memory_space<vmem>>) attributes {dimension_semantics = [#tpu.dimension_semantics<parallel>], iteration_bounds = array<i64: 2>, scalar_prefetch = 0 : i64, scratch_operands = 0 : i64, tpu.core_type = #tpu.core_type<tc>, window_params = [{transform_indices = @transform_0, window_bounds = array<i64: 16, 8>}, {pipeline_mode = #tpu.pipeline_mode<synchronous>, transform_indices = @transform_1, window_bounds = array<i64: 1, 32>}, {pipeline_mode = #tpu.pipeline_mode<synchronous>, transform_indices = @transform_2, window_bounds = array<i64: 8, 32>}, {pipeline_mode = #tpu.pipeline_mode<synchronous>, transform_indices = @transform_3, window_bounds = array<i64: 1, 32>}, {pipeline_mode = #tpu.pipeline_mode<synchronous>, transform_indices = @transform_4, window_bounds = array<i64: 2, 32, 32>}, {pipeline_mode = #tpu.pipeline_mode<synchronous>, transform_indices = @transform_5, window_bounds = array<i64: 2, 1, 32>}, {pipeline_mode = #tpu.pipeline_mode<synchronous>, transform_indices = @transform_6, window_bounds = array<i64: 2, 32, 32>}, {pipeline_mode = #tpu.pipeline_mode<synchronous>, transform_indices = @transform_7, window_bounds = array<i64: 12, 32, 32>}, {pipeline_mode = #tpu.pipeline_mode<synchronous>, transform_indices = @transform_8, window_bounds = array<i64: 4, 32, 32>}, {pipeline_mode = #tpu.pipeline_mode<synchronous>, transform_indices = @transform_9, window_bounds = array<i64: 10, 1, 32>}, {pipeline_mode = #tpu.pipeline_mode<synchronous>, transform_indices = @transform_10, window_bounds = array<i64: 32, 8>}, {pipeline_mode = #tpu.pipeline_mode<synchronous>, transform_indices = @transform_11, window_bounds = array<i64: 1, 8>}, {transform_indices = @transform_12, window_bounds = array<i64: 16, 8>}]} {
    %c0 = arith.constant 0 : index
    %c0_0 = arith.constant 0 : index
    %0 = vector.load %arg1[%c0, %c0_0] : memref<16x8xf32, #tpu.memory_space<vmem>>, vector<16x8xf32>
    %c0_1 = arith.constant 0 : index
    %c0_2 = arith.constant 0 : index
    %1 = vector.load %arg3[%c0_1, %c0_2] : memref<8x32xbf16, #tpu.memory_space<vmem>>, vector<8x32xbf16>
    %2 = arith.truncf %0 : vector<16x8xf32> to vector<16x8xbf16>
    %cst = arith.constant dense<0.000000e+00> : vector<16x32xf32>
    %3 = tpu.matmul %2, %1, %cst {dimension_numbers = #tpu.dot_dimension_numbers<[1], [0], [0], [1], [0, 0, 1, 1], [], []>} : vector<16x8xbf16>, vector<8x32xbf16>, vector<16x32xf32> -> vector<16x32xf32>
    %c0_3 = arith.constant 0 : index
    %c0_4 = arith.constant 0 : index
    %4 = vector.load %arg4[%c0_3, %c0_4] : memref<1x32xf32, #tpu.memory_space<vmem>>, vector<1x32xf32>
    %5 = vector.broadcast %4 : vector<1x32xf32> to vector<16x32xf32>
    %6 = arith.addf %3, %5 : vector<16x32xf32>
    %cst_5 = arith.constant 0.000000e+00 : f32
    %7 = vector.broadcast %cst_5 : f32 to vector<16x32xf32>
    %8 = arith.maximumf %6, %7 : vector<16x32xf32>
    %c0_6 = arith.constant 0 : index
    %c0_7 = arith.constant 0 : index
    %9 = vector.load %arg2[%c0_6, %c0_7] : memref<1x32xf32, #tpu.memory_space<vmem>>, vector<1x32xf32>
    %c0_8 = arith.constant 0 : index
    %c0_9 = arith.constant 0 : index
    %c0_10 = arith.constant 0 : index
    %10 = vector.load %arg5[%c0_8, %c0_9, %c0_10] : memref<2x32x32xbf16, #tpu.memory_space<vmem>>, vector<1x32x32xbf16>
    %11 = vector.shape_cast %10 : vector<1x32x32xbf16> to vector<32x32xbf16>
    %12 = arith.truncf %9 : vector<1x32xf32> to vector<1x32xbf16>
    %cst_11 = arith.constant dense<0.000000e+00> : vector<1x32xf32>
    %13 = tpu.matmul %12, %11, %cst_11 {dimension_numbers = #tpu.dot_dimension_numbers<[1], [0], [0], [1], [0, 0, 1, 1], [], []>} : vector<1x32xbf16>, vector<32x32xbf16>, vector<1x32xf32> -> vector<1x32xf32>
    %c0_12 = arith.constant 0 : index
    %c0_13 = arith.constant 0 : index
    %c0_14 = arith.constant 0 : index
    %14 = vector.load %arg6[%c0_12, %c0_13, %c0_14] : memref<2x1x32xf32, #tpu.memory_space<vmem>>, vector<1x1x32xf32>
    %15 = vector.shape_cast %14 : vector<1x1x32xf32> to vector<1x32xf32>
    %16 = arith.addf %13, %15 : vector<1x32xf32>
    %17 = arith.negf %16 : vector<1x32xf32>
    %18 = math.exp %17 : vector<1x32xf32>
    %cst_15 = arith.constant 1.000000e+00 : f32
    %19 = vector.broadcast %cst_15 : f32 to vector<1x32xf32>
    %20 = arith.addf %19, %18 : vector<1x32xf32>
    %21 = arith.divf %19, %20 : vector<1x32xf32>
    %22 = arith.mulf %16, %21 : vector<1x32xf32>
    %c1 = arith.constant 1 : index
    %c0_16 = arith.constant 0 : index
    %c0_17 = arith.constant 0 : index
    %23 = vector.load %arg5[%c1, %c0_16, %c0_17] : memref<2x32x32xbf16, #tpu.memory_space<vmem>>, vector<1x32x32xbf16>
    %24 = vector.shape_cast %23 : vector<1x32x32xbf16> to vector<32x32xbf16>
    %25 = arith.truncf %22 : vector<1x32xf32> to vector<1x32xbf16>
    %cst_18 = arith.constant dense<0.000000e+00> : vector<1x32xf32>
    %26 = tpu.matmul %25, %24, %cst_18 {dimension_numbers = #tpu.dot_dimension_numbers<[1], [0], [0], [1], [0, 0, 1, 1], [], []>} : vector<1x32xbf16>, vector<32x32xbf16>, vector<1x32xf32> -> vector<1x32xf32>
    %c1_19 = arith.constant 1 : index
    %c0_20 = arith.constant 0 : index
    %c0_21 = arith.constant 0 : index
    %27 = vector.load %arg6[%c1_19, %c0_20, %c0_21] : memref<2x1x32xf32, #tpu.memory_space<vmem>>, vector<1x1x32xf32>
    %28 = vector.shape_cast %27 : vector<1x1x32xf32> to vector<1x32xf32>
    %29 = arith.addf %26, %28 : vector<1x32xf32>
    %30 = arith.negf %29 : vector<1x32xf32>
    %31 = math.exp %30 : vector<1x32xf32>
    %cst_22 = arith.constant 1.000000e+00 : f32
    %32 = vector.broadcast %cst_22 : f32 to vector<1x32xf32>
    %33 = arith.addf %32, %31 : vector<1x32xf32>
    %34 = arith.divf %32, %33 : vector<1x32xf32>
    %35 = arith.mulf %29, %34 : vector<1x32xf32>
    %36 = tpu.iota {dimensions = array<i32: 0>} : vector<16x32xi32>
    %cst_23 = arith.constant 0.000000e+00 : f32
    %37 = vector.broadcast %cst_23 : f32 to vector<16x32xf32>
    %c0_24 = arith.constant 0 : index
    %c0_25 = arith.constant 0 : index
    %c0_26 = arith.constant 0 : index
    %38 = vector.load %arg7[%c0_24, %c0_25, %c0_26] : memref<2x32x32xbf16, #tpu.memory_space<vmem>>, vector<1x32x32xbf16>
    %39 = vector.shape_cast %38 : vector<1x32x32xbf16> to vector<32x32xbf16>
    %40 = arith.truncf %35 : vector<1x32xf32> to vector<1x32xbf16>
    %cst_27 = arith.constant dense<0.000000e+00> : vector<1x32xf32>
    %41 = tpu.matmul %40, %39, %cst_27 {dimension_numbers = #tpu.dot_dimension_numbers<[1], [0], [0], [1], [0, 0, 1, 1], [], []>} : vector<1x32xbf16>, vector<32x32xbf16>, vector<1x32xf32> -> vector<1x32xf32>
    %c0_28 = arith.constant 0 : index
    %c0_29 = arith.constant 0 : index
    %c0_30 = arith.constant 0 : index
    %42 = vector.load %arg10[%c0_28, %c0_29, %c0_30] : memref<10x1x32xf32, #tpu.memory_space<vmem>>, vector<1x1x32xf32>
    %43 = vector.shape_cast %42 : vector<1x1x32xf32> to vector<1x32xf32>
    %44 = arith.addf %41, %43 : vector<1x32xf32>
    %45 = vector.broadcast %44 : vector<1x32xf32> to vector<16x32xf32>
    %46 = arith.addf %8, %45 : vector<16x32xf32>
    %c1_i32 = arith.constant 1 : i32
    %47 = vector.broadcast %c1_i32 : i32 to vector<16x32xi32>
    %48 = arith.cmpi sge, %36, %47 : vector<16x32xi32>
    %c1_i32_31 = arith.constant 1 : i32
    %49 = tpu.dynamic_rotate %46 by %c1_i32_31 dim 0 : vector<16x32xf32>, i32 -> vector<16x32xf32>
    %cst_32 = arith.constant 0.000000e+00 : f32
    %50 = vector.broadcast %cst_32 : f32 to vector<16x32xf32>
    %51 = arith.select %48, %49, %50 : vector<16x32xi1>, vector<16x32xf32>
    %c15_i32 = arith.constant 15 : i32
    %52 = vector.broadcast %c15_i32 : i32 to vector<16x32xi32>
    %53 = arith.cmpi slt, %36, %52 : vector<16x32xi32>
    %c15_i32_33 = arith.constant 15 : i32
    %54 = tpu.dynamic_rotate %46 by %c15_i32_33 dim 0 : vector<16x32xf32>, i32 -> vector<16x32xf32>
    %cst_34 = arith.constant 0.000000e+00 : f32
    %55 = vector.broadcast %cst_34 : f32 to vector<16x32xf32>
    %56 = arith.select %53, %54, %55 : vector<16x32xi1>, vector<16x32xf32>
    %57 = arith.truncf %46 : vector<16x32xf32> to vector<16x32xbf16>
    %58 = arith.truncf %51 : vector<16x32xf32> to vector<16x32xbf16>
    %59 = arith.truncf %56 : vector<16x32xf32> to vector<16x32xbf16>
    %c0_35 = arith.constant 0 : index
    %c0_36 = arith.constant 0 : index
    %c0_37 = arith.constant 0 : index
    %60 = vector.load %arg8[%c0_35, %c0_36, %c0_37] : memref<12x32x32xbf16, #tpu.memory_space<vmem>>, vector<1x32x32xbf16>
    %61 = vector.shape_cast %60 : vector<1x32x32xbf16> to vector<32x32xbf16>
    %cst_38 = arith.constant dense<0.000000e+00> : vector<16x32xf32>
    %62 = tpu.matmul %58, %61, %cst_38 {dimension_numbers = #tpu.dot_dimension_numbers<[1], [0], [0], [1], [0, 0, 1, 1], [], []>} : vector<16x32xbf16>, vector<32x32xbf16>, vector<16x32xf32> -> vector<16x32xf32>
    %c1_39 = arith.constant 1 : index
    %c0_40 = arith.constant 0 : index
    %c0_41 = arith.constant 0 : index
    %63 = vector.load %arg8[%c1_39, %c0_40, %c0_41] : memref<12x32x32xbf16, #tpu.memory_space<vmem>>, vector<1x32x32xbf16>
    %64 = vector.shape_cast %63 : vector<1x32x32xbf16> to vector<32x32xbf16>
    %cst_42 = arith.constant dense<0.000000e+00> : vector<16x32xf32>
    %65 = tpu.matmul %57, %64, %cst_42 {dimension_numbers = #tpu.dot_dimension_numbers<[1], [0], [0], [1], [0, 0, 1, 1], [], []>} : vector<16x32xbf16>, vector<32x32xbf16>, vector<16x32xf32> -> vector<16x32xf32>
    %66 = arith.addf %62, %65 : vector<16x32xf32>
    %c2 = arith.constant 2 : index
    %c0_43 = arith.constant 0 : index
    %c0_44 = arith.constant 0 : index
    %67 = vector.load %arg8[%c2, %c0_43, %c0_44] : memref<12x32x32xbf16, #tpu.memory_space<vmem>>, vector<1x32x32xbf16>
    %68 = vector.shape_cast %67 : vector<1x32x32xbf16> to vector<32x32xbf16>
    %cst_45 = arith.constant dense<0.000000e+00> : vector<16x32xf32>
    %69 = tpu.matmul %59, %68, %cst_45 {dimension_numbers = #tpu.dot_dimension_numbers<[1], [0], [0], [1], [0, 0, 1, 1], [], []>} : vector<16x32xbf16>, vector<32x32xbf16>, vector<16x32xf32> -> vector<16x32xf32>
    %70 = arith.addf %66, %69 : vector<16x32xf32>
    %c1_46 = arith.constant 1 : index
    %c0_47 = arith.constant 0 : index
    %c0_48 = arith.constant 0 : index
    %71 = vector.load %arg10[%c1_46, %c0_47, %c0_48] : memref<10x1x32xf32, #tpu.memory_space<vmem>>, vector<1x1x32xf32>
    %72 = vector.shape_cast %71 : vector<1x1x32xf32> to vector<1x32xf32>
    %73 = vector.broadcast %72 : vector<1x32xf32> to vector<16x32xf32>
    %74 = arith.addf %70, %73 : vector<16x32xf32>
    %c3 = arith.constant 3 : index
    %c0_49 = arith.constant 0 : index
    %c0_50 = arith.constant 0 : index
    %75 = vector.load %arg8[%c3, %c0_49, %c0_50] : memref<12x32x32xbf16, #tpu.memory_space<vmem>>, vector<1x32x32xbf16>
    %76 = vector.shape_cast %75 : vector<1x32x32xbf16> to vector<32x32xbf16>
    %cst_51 = arith.constant dense<0.000000e+00> : vector<16x32xf32>
    %77 = tpu.matmul %58, %76, %cst_51 {dimension_numbers = #tpu.dot_dimension_numbers<[1], [0], [0], [1], [0, 0, 1, 1], [], []>} : vector<16x32xbf16>, vector<32x32xbf16>, vector<16x32xf32> -> vector<16x32xf32>
    %c4 = arith.constant 4 : index
    %c0_52 = arith.constant 0 : index
    %c0_53 = arith.constant 0 : index
    %78 = vector.load %arg8[%c4, %c0_52, %c0_53] : memref<12x32x32xbf16, #tpu.memory_space<vmem>>, vector<1x32x32xbf16>
    %79 = vector.shape_cast %78 : vector<1x32x32xbf16> to vector<32x32xbf16>
    %cst_54 = arith.constant dense<0.000000e+00> : vector<16x32xf32>
    %80 = tpu.matmul %57, %79, %cst_54 {dimension_numbers = #tpu.dot_dimension_numbers<[1], [0], [0], [1], [0, 0, 1, 1], [], []>} : vector<16x32xbf16>, vector<32x32xbf16>, vector<16x32xf32> -> vector<16x32xf32>
    %81 = arith.addf %77, %80 : vector<16x32xf32>
    %c5 = arith.constant 5 : index
    %c0_55 = arith.constant 0 : index
    %c0_56 = arith.constant 0 : index
    %82 = vector.load %arg8[%c5, %c0_55, %c0_56] : memref<12x32x32xbf16, #tpu.memory_space<vmem>>, vector<1x32x32xbf16>
    %83 = vector.shape_cast %82 : vector<1x32x32xbf16> to vector<32x32xbf16>
    %cst_57 = arith.constant dense<0.000000e+00> : vector<16x32xf32>
    %84 = tpu.matmul %59, %83, %cst_57 {dimension_numbers = #tpu.dot_dimension_numbers<[1], [0], [0], [1], [0, 0, 1, 1], [], []>} : vector<16x32xbf16>, vector<32x32xbf16>, vector<16x32xf32> -> vector<16x32xf32>
    %85 = arith.addf %81, %84 : vector<16x32xf32>
    %c2_58 = arith.constant 2 : index
    %c0_59 = arith.constant 0 : index
    %c0_60 = arith.constant 0 : index
    %86 = vector.load %arg10[%c2_58, %c0_59, %c0_60] : memref<10x1x32xf32, #tpu.memory_space<vmem>>, vector<1x1x32xf32>
    %87 = vector.shape_cast %86 : vector<1x1x32xf32> to vector<1x32xf32>
    %88 = vector.broadcast %87 : vector<1x32xf32> to vector<16x32xf32>
    %89 = arith.addf %85, %88 : vector<16x32xf32>
    %90 = math.tanh %74 : vector<16x32xf32>
    %91 = arith.negf %89 : vector<16x32xf32>
    %92 = math.exp %91 : vector<16x32xf32>
    %cst_61 = arith.constant 1.000000e+00 : f32
    %93 = vector.broadcast %cst_61 : f32 to vector<16x32xf32>
    %94 = arith.addf %93, %92 : vector<16x32xf32>
    %95 = arith.divf %93, %94 : vector<16x32xf32>
    %96 = arith.mulf %90, %95 : vector<16x32xf32>
    %97 = arith.truncf %96 : vector<16x32xf32> to vector<16x32xbf16>
    %c0_62 = arith.constant 0 : index
    %c0_63 = arith.constant 0 : index
    %c0_64 = arith.constant 0 : index
    %98 = vector.load %arg9[%c0_62, %c0_63, %c0_64] : memref<4x32x32xbf16, #tpu.memory_space<vmem>>, vector<1x32x32xbf16>
    %99 = vector.shape_cast %98 : vector<1x32x32xbf16> to vector<32x32xbf16>
    %cst_65 = arith.constant dense<0.000000e+00> : vector<16x32xf32>
    %100 = tpu.matmul %97, %99, %cst_65 {dimension_numbers = #tpu.dot_dimension_numbers<[1], [0], [0], [1], [0, 0, 1, 1], [], []>} : vector<16x32xbf16>, vector<32x32xbf16>, vector<16x32xf32> -> vector<16x32xf32>
    %c3_66 = arith.constant 3 : index
    %c0_67 = arith.constant 0 : index
    %c0_68 = arith.constant 0 : index
    %101 = vector.load %arg10[%c3_66, %c0_67, %c0_68] : memref<10x1x32xf32, #tpu.memory_space<vmem>>, vector<1x1x32xf32>
    %102 = vector.shape_cast %101 : vector<1x1x32xf32> to vector<1x32xf32>
    %103 = vector.broadcast %102 : vector<1x32xf32> to vector<16x32xf32>
    %104 = arith.addf %100, %103 : vector<16x32xf32>
    %c1_69 = arith.constant 1 : index
    %c0_70 = arith.constant 0 : index
    %c0_71 = arith.constant 0 : index
    %105 = vector.load %arg9[%c1_69, %c0_70, %c0_71] : memref<4x32x32xbf16, #tpu.memory_space<vmem>>, vector<1x32x32xbf16>
    %106 = vector.shape_cast %105 : vector<1x32x32xbf16> to vector<32x32xbf16>
    %cst_72 = arith.constant dense<0.000000e+00> : vector<16x32xf32>
    %107 = tpu.matmul %97, %106, %cst_72 {dimension_numbers = #tpu.dot_dimension_numbers<[1], [0], [0], [1], [0, 0, 1, 1], [], []>} : vector<16x32xbf16>, vector<32x32xbf16>, vector<16x32xf32> -> vector<16x32xf32>
    %c4_73 = arith.constant 4 : index
    %c0_74 = arith.constant 0 : index
    %c0_75 = arith.constant 0 : index
    %108 = vector.load %arg10[%c4_73, %c0_74, %c0_75] : memref<10x1x32xf32, #tpu.memory_space<vmem>>, vector<1x1x32xf32>
    %109 = vector.shape_cast %108 : vector<1x1x32xf32> to vector<1x32xf32>
    %110 = vector.broadcast %109 : vector<1x32xf32> to vector<16x32xf32>
    %111 = arith.addf %107, %110 : vector<16x32xf32>
    %112 = arith.addf %8, %104 : vector<16x32xf32>
    %cst_76 = arith.constant 0.707106769 : f32
    %113 = vector.broadcast %cst_76 : f32 to vector<16x32xf32>
    %114 = arith.mulf %112, %113 : vector<16x32xf32>
    %115 = arith.addf %37, %111 : vector<16x32xf32>
    %c1_77 = arith.constant 1 : index
    %c0_78 = arith.constant 0 : index
    %c0_79 = arith.constant 0 : index
    %116 = vector.load %arg7[%c1_77, %c0_78, %c0_79] : memref<2x32x32xbf16, #tpu.memory_space<vmem>>, vector<1x32x32xbf16>
    %117 = vector.shape_cast %116 : vector<1x32x32xbf16> to vector<32x32xbf16>
    %118 = arith.truncf %35 : vector<1x32xf32> to vector<1x32xbf16>
    %cst_80 = arith.constant dense<0.000000e+00> : vector<1x32xf32>
    %119 = tpu.matmul %118, %117, %cst_80 {dimension_numbers = #tpu.dot_dimension_numbers<[1], [0], [0], [1], [0, 0, 1, 1], [], []>} : vector<1x32xbf16>, vector<32x32xbf16>, vector<1x32xf32> -> vector<1x32xf32>
    %c5_81 = arith.constant 5 : index
    %c0_82 = arith.constant 0 : index
    %c0_83 = arith.constant 0 : index
    %120 = vector.load %arg10[%c5_81, %c0_82, %c0_83] : memref<10x1x32xf32, #tpu.memory_space<vmem>>, vector<1x1x32xf32>
    %121 = vector.shape_cast %120 : vector<1x1x32xf32> to vector<1x32xf32>
    %122 = arith.addf %119, %121 : vector<1x32xf32>
    %123 = vector.broadcast %122 : vector<1x32xf32> to vector<16x32xf32>
    %124 = arith.addf %114, %123 : vector<16x32xf32>
    %c2_i32 = arith.constant 2 : i32
    %125 = vector.broadcast %c2_i32 : i32 to vector<16x32xi32>
    %126 = arith.cmpi sge, %36, %125 : vector<16x32xi32>
    %c2_i32_84 = arith.constant 2 : i32
    %127 = tpu.dynamic_rotate %124 by %c2_i32_84 dim 0 : vector<16x32xf32>, i32 -> vector<16x32xf32>
    %cst_85 = arith.constant 0.000000e+00 : f32
    %128 = vector.broadcast %cst_85 : f32 to vector<16x32xf32>
    %129 = arith.select %126, %127, %128 : vector<16x32xi1>, vector<16x32xf32>
    %c14_i32 = arith.constant 14 : i32
    %130 = vector.broadcast %c14_i32 : i32 to vector<16x32xi32>
    %131 = arith.cmpi slt, %36, %130 : vector<16x32xi32>
    %c14_i32_86 = arith.constant 14 : i32
    %132 = tpu.dynamic_rotate %124 by %c14_i32_86 dim 0 : vector<16x32xf32>, i32 -> vector<16x32xf32>
    %cst_87 = arith.constant 0.000000e+00 : f32
    %133 = vector.broadcast %cst_87 : f32 to vector<16x32xf32>
    %134 = arith.select %131, %132, %133 : vector<16x32xi1>, vector<16x32xf32>
    %135 = arith.truncf %124 : vector<16x32xf32> to vector<16x32xbf16>
    %136 = arith.truncf %129 : vector<16x32xf32> to vector<16x32xbf16>
    %137 = arith.truncf %134 : vector<16x32xf32> to vector<16x32xbf16>
    %c6 = arith.constant 6 : index
    %c0_88 = arith.constant 0 : index
    %c0_89 = arith.constant 0 : index
    %138 = vector.load %arg8[%c6, %c0_88, %c0_89] : memref<12x32x32xbf16, #tpu.memory_space<vmem>>, vector<1x32x32xbf16>
    %139 = vector.shape_cast %138 : vector<1x32x32xbf16> to vector<32x32xbf16>
    %cst_90 = arith.constant dense<0.000000e+00> : vector<16x32xf32>
    %140 = tpu.matmul %136, %139, %cst_90 {dimension_numbers = #tpu.dot_dimension_numbers<[1], [0], [0], [1], [0, 0, 1, 1], [], []>} : vector<16x32xbf16>, vector<32x32xbf16>, vector<16x32xf32> -> vector<16x32xf32>
    %c7 = arith.constant 7 : index
    %c0_91 = arith.constant 0 : index
    %c0_92 = arith.constant 0 : index
    %141 = vector.load %arg8[%c7, %c0_91, %c0_92] : memref<12x32x32xbf16, #tpu.memory_space<vmem>>, vector<1x32x32xbf16>
    %142 = vector.shape_cast %141 : vector<1x32x32xbf16> to vector<32x32xbf16>
    %cst_93 = arith.constant dense<0.000000e+00> : vector<16x32xf32>
    %143 = tpu.matmul %135, %142, %cst_93 {dimension_numbers = #tpu.dot_dimension_numbers<[1], [0], [0], [1], [0, 0, 1, 1], [], []>} : vector<16x32xbf16>, vector<32x32xbf16>, vector<16x32xf32> -> vector<16x32xf32>
    %144 = arith.addf %140, %143 : vector<16x32xf32>
    %c8 = arith.constant 8 : index
    %c0_94 = arith.constant 0 : index
    %c0_95 = arith.constant 0 : index
    %145 = vector.load %arg8[%c8, %c0_94, %c0_95] : memref<12x32x32xbf16, #tpu.memory_space<vmem>>, vector<1x32x32xbf16>
    %146 = vector.shape_cast %145 : vector<1x32x32xbf16> to vector<32x32xbf16>
    %cst_96 = arith.constant dense<0.000000e+00> : vector<16x32xf32>
    %147 = tpu.matmul %137, %146, %cst_96 {dimension_numbers = #tpu.dot_dimension_numbers<[1], [0], [0], [1], [0, 0, 1, 1], [], []>} : vector<16x32xbf16>, vector<32x32xbf16>, vector<16x32xf32> -> vector<16x32xf32>
    %148 = arith.addf %144, %147 : vector<16x32xf32>
    %c6_97 = arith.constant 6 : index
    %c0_98 = arith.constant 0 : index
    %c0_99 = arith.constant 0 : index
    %149 = vector.load %arg10[%c6_97, %c0_98, %c0_99] : memref<10x1x32xf32, #tpu.memory_space<vmem>>, vector<1x1x32xf32>
    %150 = vector.shape_cast %149 : vector<1x1x32xf32> to vector<1x32xf32>
    %151 = vector.broadcast %150 : vector<1x32xf32> to vector<16x32xf32>
    %152 = arith.addf %148, %151 : vector<16x32xf32>
    %c9 = arith.constant 9 : index
    %c0_100 = arith.constant 0 : index
    %c0_101 = arith.constant 0 : index
    %153 = vector.load %arg8[%c9, %c0_100, %c0_101] : memref<12x32x32xbf16, #tpu.memory_space<vmem>>, vector<1x32x32xbf16>
    %154 = vector.shape_cast %153 : vector<1x32x32xbf16> to vector<32x32xbf16>
    %cst_102 = arith.constant dense<0.000000e+00> : vector<16x32xf32>
    %155 = tpu.matmul %136, %154, %cst_102 {dimension_numbers = #tpu.dot_dimension_numbers<[1], [0], [0], [1], [0, 0, 1, 1], [], []>} : vector<16x32xbf16>, vector<32x32xbf16>, vector<16x32xf32> -> vector<16x32xf32>
    %c10 = arith.constant 10 : index
    %c0_103 = arith.constant 0 : index
    %c0_104 = arith.constant 0 : index
    %156 = vector.load %arg8[%c10, %c0_103, %c0_104] : memref<12x32x32xbf16, #tpu.memory_space<vmem>>, vector<1x32x32xbf16>
    %157 = vector.shape_cast %156 : vector<1x32x32xbf16> to vector<32x32xbf16>
    %cst_105 = arith.constant dense<0.000000e+00> : vector<16x32xf32>
    %158 = tpu.matmul %135, %157, %cst_105 {dimension_numbers = #tpu.dot_dimension_numbers<[1], [0], [0], [1], [0, 0, 1, 1], [], []>} : vector<16x32xbf16>, vector<32x32xbf16>, vector<16x32xf32> -> vector<16x32xf32>
    %159 = arith.addf %155, %158 : vector<16x32xf32>
    %c11 = arith.constant 11 : index
    %c0_106 = arith.constant 0 : index
    %c0_107 = arith.constant 0 : index
    %160 = vector.load %arg8[%c11, %c0_106, %c0_107] : memref<12x32x32xbf16, #tpu.memory_space<vmem>>, vector<1x32x32xbf16>
    %161 = vector.shape_cast %160 : vector<1x32x32xbf16> to vector<32x32xbf16>
    %cst_108 = arith.constant dense<0.000000e+00> : vector<16x32xf32>
    %162 = tpu.matmul %137, %161, %cst_108 {dimension_numbers = #tpu.dot_dimension_numbers<[1], [0], [0], [1], [0, 0, 1, 1], [], []>} : vector<16x32xbf16>, vector<32x32xbf16>, vector<16x32xf32> -> vector<16x32xf32>
    %163 = arith.addf %159, %162 : vector<16x32xf32>
    %c7_109 = arith.constant 7 : index
    %c0_110 = arith.constant 0 : index
    %c0_111 = arith.constant 0 : index
    %164 = vector.load %arg10[%c7_109, %c0_110, %c0_111] : memref<10x1x32xf32, #tpu.memory_space<vmem>>, vector<1x1x32xf32>
    %165 = vector.shape_cast %164 : vector<1x1x32xf32> to vector<1x32xf32>
    %166 = vector.broadcast %165 : vector<1x32xf32> to vector<16x32xf32>
    %167 = arith.addf %163, %166 : vector<16x32xf32>
    %168 = math.tanh %152 : vector<16x32xf32>
    %169 = arith.negf %167 : vector<16x32xf32>
    %170 = math.exp %169 : vector<16x32xf32>
    %cst_112 = arith.constant 1.000000e+00 : f32
    %171 = vector.broadcast %cst_112 : f32 to vector<16x32xf32>
    %172 = arith.addf %171, %170 : vector<16x32xf32>
    %173 = arith.divf %171, %172 : vector<16x32xf32>
    %174 = arith.mulf %168, %173 : vector<16x32xf32>
    %175 = arith.truncf %174 : vector<16x32xf32> to vector<16x32xbf16>
    %c3_113 = arith.constant 3 : index
    %c0_114 = arith.constant 0 : index
    %c0_115 = arith.constant 0 : index
    %176 = vector.load %arg9[%c3_113, %c0_114, %c0_115] : memref<4x32x32xbf16, #tpu.memory_space<vmem>>, vector<1x32x32xbf16>
    %177 = vector.shape_cast %176 : vector<1x32x32xbf16> to vector<32x32xbf16>
    %cst_116 = arith.constant dense<0.000000e+00> : vector<16x32xf32>
    %178 = tpu.matmul %175, %177, %cst_116 {dimension_numbers = #tpu.dot_dimension_numbers<[1], [0], [0], [1], [0, 0, 1, 1], [], []>} : vector<16x32xbf16>, vector<32x32xbf16>, vector<16x32xf32> -> vector<16x32xf32>
    %c9_117 = arith.constant 9 : index
    %c0_118 = arith.constant 0 : index
    %c0_119 = arith.constant 0 : index
    %179 = vector.load %arg10[%c9_117, %c0_118, %c0_119] : memref<10x1x32xf32, #tpu.memory_space<vmem>>, vector<1x1x32xf32>
    %180 = vector.shape_cast %179 : vector<1x1x32xf32> to vector<1x32xf32>
    %181 = vector.broadcast %180 : vector<1x32xf32> to vector<16x32xf32>
    %182 = arith.addf %178, %181 : vector<16x32xf32>
    %183 = arith.addf %115, %182 : vector<16x32xf32>
    %c0_120 = arith.constant 0 : index
    %c0_121 = arith.constant 0 : index
    %184 = vector.load %arg11[%c0_120, %c0_121] : memref<32x8xbf16, #tpu.memory_space<vmem>>, vector<32x8xbf16>
    %185 = arith.truncf %183 : vector<16x32xf32> to vector<16x32xbf16>
    %cst_122 = arith.constant dense<0.000000e+00> : vector<16x8xf32>
    %186 = tpu.matmul %185, %184, %cst_122 {dimension_numbers = #tpu.dot_dimension_numbers<[1], [0], [0], [1], [0, 0, 1, 1], [], []>} : vector<16x32xbf16>, vector<32x8xbf16>, vector<16x8xf32> -> vector<16x8xf32>
    %c0_123 = arith.constant 0 : index
    %c0_124 = arith.constant 0 : index
    %187 = vector.load %arg12[%c0_123, %c0_124] : memref<1x8xf32, #tpu.memory_space<vmem>>, vector<1x8xf32>
    %188 = vector.broadcast %187 : vector<1x8xf32> to vector<16x8xf32>
    %189 = arith.addf %186, %188 : vector<16x8xf32>
    %c0_125 = arith.constant 0 : index
    %c0_126 = arith.constant 0 : index
    %190 = vector.load %arg13[%c0_125, %c0_126] : memref<16x8xf32, #tpu.memory_space<vmem>>, vector<16x8xf32>
    tpu.vector_store %arg13[%c0_125, %c0_126], %189 {strides = array<i32>} : memref<16x8xf32, #tpu.memory_space<vmem>>, vector<16x8xf32>,
    return
  }
  func.func @transform_0(%arg0: i32) -> (i32, i32) {
    %c0_i32 = arith.constant 0 : i32
    %c0_i32_0 = arith.constant 0 : i32
    return %arg0, %c0_i32 : i32, i32
  }
  func.func @transform_1(%arg0: i32) -> (i32, i32) {
    %c0_i32 = arith.constant 0 : i32
    %c0_i32_0 = arith.constant 0 : i32
    %c0_i32_1 = arith.constant 0 : i32
    return %c0_i32, %c0_i32_0 : i32, i32
  }
  func.func @transform_2(%arg0: i32) -> (i32, i32) {
    %c0_i32 = arith.constant 0 : i32
    %c0_i32_0 = arith.constant 0 : i32
    %c0_i32_1 = arith.constant 0 : i32
    return %c0_i32, %c0_i32_0 : i32, i32
  }
  func.func @transform_3(%arg0: i32) -> (i32, i32) {
    %c0_i32 = arith.constant 0 : i32
    %c0_i32_0 = arith.constant 0 : i32
    %c0_i32_1 = arith.constant 0 : i32
    return %c0_i32, %c0_i32_0 : i32, i32
  }
  func.func @transform_4(%arg0: i32) -> (i32, i32, i32) {
    %c0_i32 = arith.constant 0 : i32
    %c0_i32_0 = arith.constant 0 : i32
    %c0_i32_1 = arith.constant 0 : i32
    %c0_i32_2 = arith.constant 0 : i32
    return %c0_i32, %c0_i32_0, %c0_i32_1 : i32, i32, i32
  }
  func.func @transform_5(%arg0: i32) -> (i32, i32, i32) {
    %c0_i32 = arith.constant 0 : i32
    %c0_i32_0 = arith.constant 0 : i32
    %c0_i32_1 = arith.constant 0 : i32
    %c0_i32_2 = arith.constant 0 : i32
    return %c0_i32, %c0_i32_0, %c0_i32_1 : i32, i32, i32
  }
  func.func @transform_6(%arg0: i32) -> (i32, i32, i32) {
    %c0_i32 = arith.constant 0 : i32
    %c0_i32_0 = arith.constant 0 : i32
    %c0_i32_1 = arith.constant 0 : i32
    %c0_i32_2 = arith.constant 0 : i32
    return %c0_i32, %c0_i32_0, %c0_i32_1 : i32, i32, i32
  }
  func.func @transform_7(%arg0: i32) -> (i32, i32, i32) {
    %c0_i32 = arith.constant 0 : i32
    %c0_i32_0 = arith.constant 0 : i32
    %c0_i32_1 = arith.constant 0 : i32
    %c0_i32_2 = arith.constant 0 : i32
    return %c0_i32, %c0_i32_0, %c0_i32_1 : i32, i32, i32
  }
  func.func @transform_8(%arg0: i32) -> (i32, i32, i32) {
    %c0_i32 = arith.constant 0 : i32
    %c0_i32_0 = arith.constant 0 : i32
    %c0_i32_1 = arith.constant 0 : i32
    %c0_i32_2 = arith.constant 0 : i32
    return %c0_i32, %c0_i32_0, %c0_i32_1 : i32, i32, i32
  }
  func.func @transform_9(%arg0: i32) -> (i32, i32, i32) {
    %c0_i32 = arith.constant 0 : i32
    %c0_i32_0 = arith.constant 0 : i32
    %c0_i32_1 = arith.constant 0 : i32
    %c0_i32_2 = arith.constant 0 : i32
    return %c0_i32, %c0_i32_0, %c0_i32_1 : i32, i32, i32
  }
  func.func @transform_10(%arg0: i32) -> (i32, i32) {
    %c0_i32 = arith.constant 0 : i32
    %c0_i32_0 = arith.constant 0 : i32
    %c0_i32_1 = arith.constant 0 : i32
    return %c0_i32, %c0_i32_0 : i32, i32
  }
  func.func @transform_11(%arg0: i32) -> (i32, i32) {
    %c0_i32 = arith.constant 0 : i32
    %c0_i32_0 = arith.constant 0 : i32
    %c0_i32_1 = arith.constant 0 : i32
    return %c0_i32, %c0_i32_0 : i32, i32
  }
  func.func @transform_12(%arg0: i32) -> (i32, i32) {
    %c0_i32 = arith.constant 0 : i32
    %c0_i32_0 = arith.constant 0 : i32
    return %arg0, %c0_i32 : i32, i32
  }
}

</mosaic_0001>

<bundles_post_ra>
// kernel: tpu_custom_call.1
= control target key start
LH: loop header
LB: loop body
LE: loop exit
PB: predicated region body
PF: predicated region fallthrough
CT: control target
= control target key end

     0   :  { %17 = vsyncpa [#allocation3], 0  ;;  %s3233_s0 = inlined_call_operand.vmem [shape: f32[32,8], index: 0, kind: input, shape index: {}]   ;;  %s3234_s1 = inlined_call_operand.hbm [shape: f32[1,32], index: 1, kind: input, shape index: {}]   ;;  %s3235_s2 = inlined_call_operand.hbm [shape: bf16[8,32], index: 2, kind: input, shape index: {}]   ;;  %s3236_s3 = inlined_call_operand.hbm [shape: f32[1,32], index: 3, kind: input, shape index: {}]   ;;  %s3237_s4 = inlined_call_operand.hbm [shape: bf16[2,32,32], index: 4, kind: input, shape index: {}]   ;;  %s3238_s5 = inlined_call_operand.hbm [shape: f32[2,1,32], index: 5, kind: input, shape index: {}]   ;;  %s3239_s6 = inlined_call_operand.hbm [shape: bf16[2,32,32], index: 6, kind: input, shape index: {}]   ;;  %s3240_s7 = inlined_call_operand.hbm [shape: bf16[12,32,32], index: 7, kind: input, shape index: {}]   ;;  %s3241_s8 = inlined_call_operand.vmem [shape: bf16[4,32,32], index: 8, kind: input, shape index: {}]   ;;  %s3242_s9 = inlined_call_operand.vmem [shape: f32[10,1,32], index: 9, kind: input, shape index: {}]   ;;  %s3243_s10 = inlined_call_operand.vmem [shape: bf16[32,8], index: 10, kind: input, shape index: {}]   ;;  %s3244_s11 = inlined_call_operand.vmem [shape: f32[1,8], index: 11, kind: input, shape index: {}]   ;;  %s3245_s12 = inlined_call_operand.vmem [shape: f32[32,8], index: 12, kind: output, shape index: {}]  }
   0x1   :  { %18 = vsyncpa [#allocation5], 0 }
   0x2   :  { %19 = vsyncpa [#allocation8], 0 }
   0x3   :  { %20 = vsyncpa [#allocation11], 0  ;;  %s2880_s21 = smov 0  }
   0x4 LB: > { %s2802_s22 = smov [#allocation4]   ;;  %s2094_s24 = sadd.s32 4294967295, %s2800_s21   ;;  %s2800_s21 = sphi %s2880_s21, %s26_s21  }
   0x5   : > { %s338_s23 = sshll.u32 %s2802_s22, 4  ;;  %p2096_p0 = scmp.ge.s32.totalorder %s2800_s21, 1  ;;  %s339_s23 = int_to_ptr.vmem [resolvable:$true] %s338_s23 }
   0x6   : > { %p314_p1 = scmp.lt.s32.totalorder %s2800_s21, 3  ;;  %p2890_p2 = scmp.eq.s32.totalorder %s2094_s24, 0 }
   0x7   : > { %s2803_s27 = smov [#allocation7]   ;;  %s2804_s30 = smov [#allocation10]  }
   0x8   : > { %s3249_s25 = scalar_select %p2890_p2, 1, 0 }
   0x9   : > { %p2894_p3 = pnand %p2096_p0, %p314_p1  ;;  %s359_s28 = sshll.u32 %s2803_s27, 4  ;;  %s2900_s28 = int_to_ptr.vmem [resolvable:$true] %s359_s28 }
   0xa   : > { %s385_s13 = sshll.u32 %s2804_s30, 4  ;;  %s2805_s14 = smov [#allocation2]   ;;  %s2908_s13 = int_to_ptr.vmem [resolvable:$true] %s385_s13 }
   0xb   : > { %s3250_s26 = scalar_select %p2894_p3, 1, 0 }
   0xc   : > { %p2467_p4 = pneg %p2894_p3  ;;  %s2910_s15 = sshll.u32 %s2805_s14, 4  ;;  %s328_s15 = int_to_ptr.vmem [resolvable:$true] %s2910_s15 }
   0xd   : > { %s2607_s17 = scalar_lea.vmem %s339_s23, 64  ;;  %p2615_p10 = scmp.lt.s32.totalorder %s339_s23, %s339_s23 }
   0xe   : > { %p2904_p5 = pnand %p2890_p2, %p2467_p4  ;;  %p2608_p7 = scmp.ne.s32.totalorder %s339_s23, %s2607_s17 }
   0xf   : > { %p2616_p11 = scmp.lt.s32.totalorder %s2607_s17, %s2607_s17 }
  0x10   : > { %p2914_p6 = pneg %p2904_p5 }
  0x11   : > { %p2617_p12 = por %p2616_p11, %p2615_p10 }
  0x12   : > { %p2610_p8 = pnand %p2608_p7, %p2914_p6 }
  0x14   : > { %p2611_p9 = pneg %p2610_p8 }
  0x16   : > { %p2618_p13 = pnand %p2617_p12, %p2611_p9 }
  0x18   : > { %2621 = shalt.err (!%p2618_p13)
}
  0x19   : > { %2473 = dma.hbm_to_vmem [thread:$0]  (!%p2904_p5), %s3235_s2, 64, %s339_s23, [#allocation5]  }
  0x1a   : > { %s2633_s20 = scalar_lea.vmem %s2900_s28, 512  ;;  %p2641_p7 = scmp.lt.s32.totalorder %s2900_s28, %s2900_s28 }
  0x1b   : > { %p2634_p0 = scmp.ne.s32.totalorder %s2900_s28, %s2633_s20  ;;  %p2642_p8 = scmp.lt.s32.totalorder %s2633_s20, %s2633_s20 }
  0x1d   : > { %p2636_p1 = pnand %p2634_p0, %p2914_p6  ;;  %p2643_p9 = por %p2642_p8, %p2641_p7 }
  0x1f   : > { %p2637_p4 = pneg %p2636_p1 }
  0x21   : > { %p2644_p10 = pnand %p2643_p9, %p2637_p4 }
  0x23   : > { %2647 = shalt.err (!%p2644_p10)
}
  0x24   : > { %s2806_s22 = smov 64   ;;  %s2807_s27 = smov 4  }
  0x25   : > { %2479 = dma.hbm_to_vmem [thread:$0]  (!%p2904_p5), %s3237_s4, 512, %s2900_s28, [#allocation8], %s2806_s22, %s2806_s22, %s2807_s27  }
  0x26   : > { %s2659_s14 = scalar_lea.vmem %s2908_s13, 512  ;;  %p2667_p0 = scmp.lt.s32.totalorder %s2908_s13, %s2908_s13 }
  0x27   : > { %p2660_p11 = scmp.ne.s32.totalorder %s2908_s13, %s2659_s14  ;;  %p2668_p1 = scmp.lt.s32.totalorder %s2659_s14, %s2659_s14 }
  0x29   : > { %p2662_p12 = pnand %p2660_p11, %p2914_p6  ;;  %p2669_p4 = por %p2668_p1, %p2667_p0 }
  0x2b   : > { %p2663_p13 = pneg %p2662_p12 }
  0x2d   : > { %p2670_p7 = pnand %p2669_p4, %p2663_p13 }
  0x2f   : > { %2673 = shalt.err (!%p2670_p7)
}
  0x30   : > { %2485 = dma.hbm_to_vmem [thread:$0]  (!%p2904_p5), %s3239_s6, 512, %s2908_s13, [#allocation11], %s2806_s22, %s2806_s22, %s2807_s27  }
  0x31   : > { %s2685_s28 = scalar_lea.vmem %s328_s15, 16  ;;  %s2692_s19 = scalar_lea.vmem %s328_s15, 32 }
  0x32   : > { %p2686_p8 = scmp.ne.s32.totalorder %s328_s15, %s2685_s28  ;;  %p2693_p11 = scmp.lt.s32.totalorder %s328_s15, %s328_s15 }
  0x33   : > { %p2694_p12 = scmp.lt.s32.totalorder %s2692_s19, %s2685_s28 }
  0x34   : > { %p2688_p9 = pnand %p2686_p8, %p2914_p6 }
  0x35   : > { %p2695_p13 = por %p2694_p12, %p2693_p11 }
  0x36   : > { %p2689_p10 = pneg %p2688_p9 }
  0x38   : > { %p2696_p0 = pnand %p2695_p13, %p2689_p10 }
  0x3a   : > { %2699 = shalt.err (!%p2696_p0)
}
  0x3b   : > { %2470 = dma.hbm_to_vmem [thread:$0]  (!%p2904_p5), %s3234_s1, 16, %s328_s15, [#allocation3]  }
  0x3c   : > { %s2808_s13 = smov [#allocation6]   ;;  %s2809_s14 = smov [#allocation9]  }
  0x3d   : > { %s349_s30 = sshll.u32 %s2808_s13, 4  ;;  %s372_s17 = sshll.u32 %s2809_s14, 4  ;;  %s350_s30 = int_to_ptr.vmem [resolvable:$true] %s349_s30  ;;  %s373_s17 = int_to_ptr.vmem [resolvable:$true] %s372_s17 }
  0x3e   : > { %s2711_s18 = scalar_lea.vmem %s350_s30, 16  ;;  %s2718_s28 = scalar_lea.vmem %s350_s30, 32 }
  0x3f   : > { %p2712_p1 = scmp.ne.s32.totalorder %s350_s30, %s2711_s18  ;;  %p2719_p8 = scmp.lt.s32.totalorder %s350_s30, %s350_s30 }
  0x40   : > { %p2720_p9 = scmp.lt.s32.totalorder %s2718_s28, %s2711_s18 }
  0x41   : > { %p2714_p4 = pnand %p2712_p1, %p2914_p6 }
  0x42   : > { %p2721_p10 = por %p2720_p9, %p2719_p8 }
  0x43   : > { %p2715_p7 = pneg %p2714_p4 }
  0x45   : > { %p2722_p11 = pnand %p2721_p10, %p2715_p7 }
  0x47   : > { %2725 = shalt.err (!%p2722_p11)
}
  0x48   : > { %2476 = dma.hbm_to_vmem [thread:$0]  (!%p2904_p5), %s3236_s3, 16, %s350_s30, [#allocation5]  }
  0x49   : > { %s2737_s20 = scalar_lea.vmem %s373_s17, 32  ;;  %p2745_p1 = scmp.lt.s32.totalorder %s373_s17, %s373_s17 }
  0x4a   : > { %p2738_p12 = scmp.ne.s32.totalorder %s373_s17, %s2737_s20  ;;  %p2746_p4 = scmp.lt.s32.totalorder %s2737_s20, %s2737_s20 }
  0x4c   : > { %p2740_p13 = pnand %p2738_p12, %p2914_p6  ;;  %p2747_p2 = por %p2746_p4, %p2745_p1 }
  0x4e   : > { %p2741_p0 = pneg %p2740_p13 }
  0x50   : > { %p2748_p3 = pnand %p2747_p2, %p2741_p0 }
  0x52   : > { %2751 = shalt.err (!%p2748_p3)
}
  0x53   : > { %s2810_s23 = smov 16   ;;  %s2811_s13 = smov 1  }
  0x54   : > { %2482 = dma.hbm_to_vmem [thread:$0]  (!%p2904_p5), %s3238_s5, 32, %s373_s17, [#allocation8], %s2810_s23, %s2810_s23, %s2811_s13  }
  0x55   : > { %s2812_s30 = smov [#allocation12]  }
  0x56   : > { %s398_s28 = sshll.u32 %s2812_s30, 4  ;;  %s399_s28 = int_to_ptr.vmem [resolvable:$true] %s398_s28 }
  0x57   : > { %s2763_s19 = scalar_lea.vmem %s399_s28, 3072  ;;  %p2771_p10 = scmp.lt.s32.totalorder %s399_s28, %s399_s28 }
  0x58   : > { %p2764_p7 = scmp.ne.s32.totalorder %s399_s28, %s2763_s19  ;;  %p2772_p2 = scmp.lt.s32.totalorder %s2763_s19, %s2763_s19 }
  0x5a   : > { %p2766_p8 = pnand %p2764_p7, %p2914_p6  ;;  %p2773_p3 = por %p2772_p2, %p2771_p10 }
  0x5c   : > { %p2767_p9 = pneg %p2766_p8 }
  0x5e   : > { %p2774_p11 = pnand %p2773_p3, %p2767_p9 }
  0x60   : > { %2777 = shalt.err (!%p2774_p11)
}
  0x61   : > { %2488 = dma.hbm_to_vmem [thread:$0]  (!%p2904_p5), %s3240_s7, 3072, %s399_s28, [#allocation11], %s2806_s22, %s2806_s22, %s2807_s27  }
  0x62   : > { %p3253_p12 = scmp.ne.s32.totalorder %s3250_s26, 0 }
  0x63   : > { %p3254_p6 = scmp.ne.s32.totalorder (!%p3253_p12), %s3249_s25, 0 }
  0x64   : > { %435 = sbr.rel (%p3253_p12) target bundleno = 1911 (0x777), region = 68 }
  0x69   : > { %2783 = dma.done.wait (%p3254_p6), [#allocation3], 16  }
  0x6a   : > { %2785 = vsyncadd (%p3254_p6), [#allocation3], 4294967280 }
  0x6b   : > { %2787 = dma.done.wait (%p3254_p6), [#allocation5], 80  }
  0x6c   : > { %2789 = vsyncadd (%p3254_p6), [#allocation5], 4294967216 }
  0x6d   : > { %2791 = dma.done.wait (%p3254_p6), [#allocation8], 544  }
  0x6e   : > { %2793 = vsyncadd (%p3254_p6), [#allocation8], 4294966752 }
  0x6f   : > { %2795 = dma.done.wait (%p3254_p6), [#allocation11], 3584  }
  0x70   : > { %2797 = vsyncadd (%p3254_p6), [#allocation11], 4294963712  ;;  %v2813_v0 = vmov 0.0   ;;  %vm2814_vm0 = vmmov 0   ;;  %v2524_v1 = vld [vmem:[#allocation7 + $0x8] sm:$0xff]   ;;  %v2525_v2 = vld [vmem:[#allocation7] sm:$0xff]   ;;  %v716_v46 = vlaneseq }
  0x71   : > { %2279 = vmatprep.subr.bf16.mxu1 %v2813_v0  ;;  %2283 = vmatprep.mubr.msk.bf16.mxu1 %vm2814_vm0, %v2813_v0  ;;  %v576_v3 = vld [vmem:[#allocation2] sm:$0x1]  ;;  %vm595_vm1 = vcmask 261120   ;;  %s2113_s25 = sshll.u32 %s2094_s24, 1  ;;  %v516_v5 = vld [vmem:[#allocation4] sm:$0xf] }
  0x72   : > { %2273 = vmatprep.subr.bf16.mxu0 %v2813_v0  ;;  %2275 = vmatprep.mubr.msk.bf16.mxu0 %vm2814_vm0, %v2813_v0  ;;  %v581_v4 = vpack.c.bf16 %v576_v3, %v576_v3  ;;  %p502_p5 = scmp.lt.s32.totalorder %s2113_s25, 3  ;;  %vm529_vm2 = vcmask 1043456   ;;  %vm525_vm3 = vcmask 64512   ;;  %v2526_v10 = vld [vmem:[#allocation7 + $0x18] sm:$0xff]   ;;  %v2527_v11 = vld [vmem:[#allocation7 + $0x10] sm:$0xff]   ;;  %v2529_v29 = vld [vmem:[#allocation10] sm:$0xff]  }
  0x73   : > { %2280 = vmatpush3.bf16.msra.mxu1 %v2524_v1  ;;  %v531_v6 = vsel %vm529_vm2, %v516_v5, 0  ;;  %v582_v12 = vld [vmem:[#allocation9] sm:$0x1]  ;;  %v2528_v28 = vld [vmem:[#allocation10 + $0x8] sm:$0xff]   ;;  %v653_v30 = vld [vmem:[#allocation9 + $0x1] sm:$0x1] }
  0x74   : > { %2281 = vmatprep.subr.bf16.mxu1 %v2813_v0  ;;  %s3256_s25 = smov (!%p502_p5, %s2113_s25), 3  ;;  %2274 = vmatpush3.bf16.msra.mxu0 %v531_v6  ;;  %v2530_v42 = vld [vmem:[#allocation12 + $0x18] sm:$0xff]   ;;  %v2531_v43 = vld [vmem:[#allocation12 + $0x8] sm:$0xff]   ;;  %v2532_v44 = vld [vmem:[#allocation12 + $0x10] sm:$0xff]   ;;  %v3047_v47 = vshrl.u32 %v716_v46, 7 }
  0x75   : > { %s2114_s26 = sshll.u32 %s3256_s25, 3  ;;  %2287 = vmatprep.subr.bf16.mxu0 %v2813_v0  ;;  %v2533_v45 = vld [vmem:[#allocation12] sm:$0xff]   ;;  %v2117_v48 = vld [vmem:[#allocation6] ss:$0 sm:$0xff]  ;;  %v724_v49 = vld [vmem:[%s3242_s9] sm:$0x1] }
  0x76   : > { %s505_s22 = scalar_lea.vmem %s3233_s0, %s2114_s26  ;;  %v782_v52 = vsub.s32 0, %v3047_v47  ;;  %vm790_vm4 = vcmp.lt.s32.totalorder %v3047_v47, 1  ;;  %vm799_vm5 = vcmp.lt.s32.totalorder %v3047_v47, 7  ;;  %vm786_vm6 = vcmp.ge.s32.totalorder %v3047_v47, 1  ;;  %v2534_v5 = vld [vmem:[#allocation12 + $0x28] sm:$0xff]   ;;  %s511_s28 = scalar_lea.vmem %s3245_s12, %s2114_s26 }
  0x77   : > { %2282 = vmatpush3.bf16.msra.mxu1 %v2525_v2  ;;  %v514_v7 = vld [vmem:[%s505_s22] sm:$0xff]  ;;  %v515_v8 = vld [vmem:[%s505_s22 + $0x8] sm:$0xff]  ;;  %v3069_v63 = vadd.s32 8, %v3047_v47  ;;  %vm1413_vm8 = vcmp.lt.s32.totalorder %v3047_v47, 2  ;;  %vm1422_vm9 = vcmp.lt.s32.totalorder %v3047_v47, 6  ;;  %vm1409_vm10 = vcmp.ge.s32.totalorder %v3047_v47, 2 }
  0x78   : > { %2295 = vmatprep.subr.bf16.mxu1 %v2813_v0  ;;  %v517_v9 = vpack.c.bf16 %v515_v8, %v514_v7  ;;  %v2558_v47 = vld [vmem:[#allocation12 + $0x90] sm:$0xff]  }
  0x79   : > { %vm796_vm7 = vcmp.lt.s32.totalorder %v3069_v63, 15  ;;  %vm1419_vm11 = vcmp.lt.s32.totalorder %v3069_v63, 14  ;;  %v2556_v63 = vld [vmem:[#allocation12 + $0x98] sm:$0xff]  }
  0x7a   : > { %2284 = vmatmul.mubr.msk.bf16.vlgmr.msra.gmra.mxu1 %vm595_vm1, %v581_v4  ;;  %2276 = vmatmul.mubr.msk.bf16.vlgmr.msra.gmra.mxu0 %vm525_vm3, %v517_v9 }
  0x7b   : > { %2299 = vmatprep.mubr.msk.bf16.mxu1 %vm2814_vm0, %v2813_v0  ;;  %2291 = vmatprep.mubr.msk.bf16.mxu0 %vm2814_vm0, %v2813_v0 }
  0x7c   : > { %2288 = vmatpush3.bf16.msra.mxu0 %v2526_v10  ;;  %2296 = vmatpush3.bf16.msra.mxu1 %v2528_v28 }
  0x7d   : > { %2289 = vmatprep.subr.bf16.mxu0 %v2813_v0  ;;  %2297 = vmatprep.subr.bf16.mxu1 %v2813_v0 }
  0x80   : > { %2290 = vmatpush3.bf16.msra.mxu0 %v2527_v11  ;;  %2298 = vmatpush3.bf16.msra.mxu1 %v2529_v29  ;;  %v2535_v11 = vld [vmem:[#allocation12 + $0x48] sm:$0xff]  }
  0x81   : > { %2303 = vmatprep.subr.bf16.mxu0 %v2813_v0  ;;  %2311 = vmatprep.subr.bf16.mxu1 %v2813_v0 }
 0x13a   : > { %v633_v13 = vpop.f32.mrf.mxu1  ;;  %v567_v24 = vpop.f32.mrf.mxu0 }
 0x13b   : > { %v634_v14 = vadd.f32 %v633_v13, %v582_v12  ;;  %v3052_v50 = vadd.f32 %v2117_v48, %v567_v24  ;;  %v2536_v13 = vld [vmem:[#allocation12 + $0x20] sm:$0xff]   ;;  %v2544_v24 = vld [vmem:[%s3241_s8] sm:$0xff]  }
 0x13c   : > { %v2285_v15 = vpop.f32.mrf.mxu1  ;;  %v2277_v25 = vpop.f32.mrf.mxu0 }
 0x13d   : > { %v2122_v16 = vmul.f32 -1.442695, %v634_v14  ;;  %v574_v56 = vmax.f32 %v3052_v50, 0.0  ;;  %v2545_v25 = vld [vmem:[%s3241_s8 + $0x10] sm:$0xff]  }
 0x13e   : > { %v636_v17 = vpop.f32.mrf.mxu1  ;;  %v570_v26 = vpop.f32.mrf.mxu0 }
 0x13f   : > { %2564 = vpow2.f32 %v2122_v16  ;;  %v3054_v51 = vadd.f32 %v2117_v48, %v570_v26  ;;  %v2537_v16 = vld [vmem:[#allocation12 + $0x40] sm:$0xff]   ;;  %v2538_v17 = vld [vmem:[#allocation12 + $0x38] sm:$0xff]  }
 0x140   : > { %v2286_v18 = vpop.f32.mrf.mxu1  ;;  %v2278_v27 = vpop.f32.mrf.mxu0  ;;  %v2151_v48 = vld [vmem:[%s3242_s9 + $0x2] ss:$0 sm:$0xff] }
 0x141   : > { %v575_v57 = vmax.f32 %v3054_v51, 0.0 }
 0x14c   : > { %v2565_v19 = vpop.eup %2564 }
 0x14d   : > { %v642_v20 = vadd.f32 1.0, %v2565_v19  ;;  %v2539_v19 = vld [vmem:[#allocation12 + $0x58] sm:$0xff]  }
 0x14f   : > { %2566 = vrcp.f32 %v642_v20  ;;  %v2540_v20 = vld [vmem:[#allocation12 + $0x30] sm:$0xff]  }
 0x15c   : > { %v2567_v21 = vpop.eup %2566 }
 0x15d   : > { %v645_v22 = vmul.f32 %v2567_v21, %v634_v14  ;;  %v2541_v21 = vld [vmem:[#allocation12 + $0x50] sm:$0xff]  }
 0x15f   : > { %v651_v23 = vpack.c.bf16 %v645_v22, %v645_v22  ;;  %v2542_v22 = vld [vmem:[%s3241_s8 + $0x8] sm:$0xff]  }
 0x161   : > { %2292 = vmatmul.mubr.msk.bf16.vlgmr.msra.gmra.mxu0 %vm595_vm1, %v651_v23  ;;  %v2543_v23 = vld [vmem:[%s3241_s8 + $0x18] sm:$0xff]  }
 0x162   : > { %2307 = vmatprep.mubr.msk.bf16.mxu0 %vm2814_vm0, %v2813_v0  ;;  %2304 = vmatpush3.bf16.msra.mxu0 %v2530_v42 }
 0x163   : > { %2305 = vmatprep.subr.bf16.mxu0 %v2813_v0 }
 0x166   : > { %2306 = vmatpush3.bf16.msra.mxu0 %v2532_v44 }
 0x167   : > { %2319 = vmatprep.subr.bf16.mxu0 %v2813_v0 }
 0x221   : > { %v703_v31 = vpop.f32.mrf.mxu0 }
 0x222   : > { %v704_v32 = vadd.f32 %v703_v31, %v653_v30 }
 0x223   : > { %v2293_v33 = vpop.f32.mrf.mxu0 }
 0x224   : > { %v2126_v34 = vmul.f32 -1.442695, %v704_v32 }
 0x225   : > { %v706_v35 = vpop.f32.mrf.mxu0 }
 0x226   : > { %2568 = vpow2.f32 %v2126_v34 }
 0x227   : > { %v2294_v36 = vpop.f32.mrf.mxu0 }
 0x233   : > { %v2569_v37 = vpop.eup %2568 }
 0x234   : > { %v712_v38 = vadd.f32 1.0, %v2569_v37 }
 0x236   : > { %2570 = vrcp.f32 %v712_v38 }
 0x243   : > { %v2571_v39 = vpop.eup %2570 }
 0x244   : > { %v715_v40 = vmul.f32 %v2571_v39, %v704_v32 }
 0x246   : > { %v3037_v41 = vpack.c.bf16 %v715_v40, %v715_v40 }
 0x248   : > { %2300 = vmatmul.mubr.msk.bf16.vlgmr.msra.gmra.mxu1 %vm595_vm1, %v3037_v41 }
 0x249   : > { %2315 = vmatprep.mubr.msk.bf16.mxu1 %vm2814_vm0, %v2813_v0  ;;  %2312 = vmatpush3.bf16.msra.mxu1 %v2531_v43 }
 0x24a   : > { %2313 = vmatprep.subr.bf16.mxu1 %v2813_v0 }
 0x24d   : > { %2314 = vmatpush3.bf16.msra.mxu1 %v2533_v45 }
 0x24e   : > { %2327 = vmatprep.subr.bf16.mxu1 %v2813_v0 }
 0x308   : > { %v774_v53 = vpop.f32.mrf.mxu1 }
 0x309   : > { %v775_v54 = vadd.f32 %v774_v53, %v724_v49 }
 0x30a   : > { %v2301_v55 = vpop.f32.mrf.mxu1 }
 0x30b   : > { %v783_v58 = vrot.slane %v775_v54, %v782_v52 }
 0x30c   : > { %v777_v59 = vpop.f32.mrf.mxu1 }
 0x30d   : > { %v784_v60 = vadd.f32 %v783_v58, %v574_v56  ;;  %v785_v61 = vadd.f32 %v783_v58, %v575_v57 }
 0x30e   : > { %v2302_v62 = vpop.f32.mrf.mxu1 }
 0x30f   : > { %v788_v1 = vrot.slane %v784_v60, 7  ;;  %v789_v2 = vrot.slane %v785_v61, 7  ;;  %v797_v3 = vrot.slane %v784_v60, 1  ;;  %v798_v4 = vrot.slane %v785_v61, 1 }
 0x310   : > { %v804_v6 = vpack.c.bf16 %v785_v61, %v784_v60 }
 0x311   : > { %v792_v7 = vsel %vm790_vm4, %v789_v2, %v788_v1  ;;  %v791_v8 = vsel %vm790_vm4, %v788_v1, %v789_v2  ;;  %v801_v9 = vsel %vm799_vm5, %v798_v4, %v797_v3  ;;  %v800_v14 = vsel %vm799_vm5, %v797_v3, %v798_v4 }
 0x312   : > { %2308 = vmatmul.mubr.msk.bf16.vlgmr.msra.gmra.mxu0 %vm595_vm1, %v804_v6  ;;  %v793_v10 = vsel %vm786_vm6, %v792_v7, 0.0  ;;  %v803_v15 = vsel %vm796_vm7, %v801_v9, 0.0  ;;  %v2140_v7 = vld [vmem:[%s3242_s9 + $0x1] ss:$0 sm:$0xff] }
 0x313   : > { %2320 = vmatpush3.bf16.msra.mxu0 %v2534_v5  ;;  %v805_v12 = vpack.c.bf16 %v791_v8, %v793_v10  ;;  %2323 = vmatprep.mubr.msk.bf16.mxu0 %vm2814_vm0, %v2813_v0  ;;  %v806_v18 = vpack.c.bf16 %v803_v15, %v800_v14 }
 0x314   : > { %2321 = vmatprep.subr.bf16.mxu0 %v2813_v0 }
 0x315   : > { %2316 = vmatmul.mubr.msk.bf16.vlgmr.msra.gmra.mxu1 %vm595_vm1, %v805_v12 }
 0x316   : > { %2328 = vmatpush3.bf16.msra.mxu1 %v2535_v11  ;;  %2331 = vmatprep.mubr.msk.bf16.mxu1 %vm2814_vm0, %v2813_v0 }
 0x317   : > { %2322 = vmatpush3.bf16.msra.mxu0 %v2536_v13  ;;  %2329 = vmatprep.subr.bf16.mxu1 %v2813_v0 }
 0x318   : > { %2335 = vmatprep.subr.bf16.mxu0 %v2813_v0 }
 0x31a   : > { %2324 = vmatmul.mubr.msk.bf16.vlgmr.msra.gmra.mxu0 %vm595_vm1, %v806_v18  ;;  %2330 = vmatpush3.bf16.msra.mxu1 %v2537_v16 }
 0x31b   : > { %2336 = vmatpush3.bf16.msra.mxu0 %v2538_v17  ;;  %2343 = vmatprep.subr.bf16.mxu1 %v2813_v0 }
 0x31c   : > { %2337 = vmatprep.subr.bf16.mxu0 %v2813_v0  ;;  %2339 = vmatprep.mubr.msk.bf16.mxu0 %vm2814_vm0, %v2813_v0 }
 0x31d   : > { %2332 = vmatmul.mubr.msk.bf16.vlgmr.msra.gmra.mxu1 %vm595_vm1, %v804_v6 }
 0x31e   : > { %2344 = vmatpush3.bf16.msra.mxu1 %v2539_v19  ;;  %2347 = vmatprep.mubr.msk.bf16.mxu1 %vm2814_vm0, %v2813_v0 }
 0x31f   : > { %2338 = vmatpush3.bf16.msra.mxu0 %v2540_v20  ;;  %2345 = vmatprep.subr.bf16.mxu1 %v2813_v0 }
 0x320   : > { %2351 = vmatprep.subr.bf16.mxu0 %v2813_v0 }
 0x322   : > { %2340 = vmatmul.mubr.msk.bf16.vlgmr.msra.gmra.mxu0 %vm595_vm1, %v805_v12  ;;  %2346 = vmatpush3.bf16.msra.mxu1 %v2541_v21  ;;  %v2546_v21 = vld [vmem:[#allocation10 + $0x18] sm:$0xff]  }
 0x323   : > { %2359 = vmatprep.subr.bf16.mxu1 %v2813_v0  ;;  %2355 = vmatprep.mubr.msk.bf16.mxu0 %vm2814_vm0, %v2813_v0 }
 0x324   : > { %2352 = vmatpush3.bf16.msra.mxu0 %v2542_v22 }
 0x325   : > { %2348 = vmatmul.mubr.msk.bf16.vlgmr.msra.gmra.mxu1 %vm595_vm1, %v806_v18  ;;  %2353 = vmatprep.subr.bf16.mxu0 %v2813_v0 }
 0x326   : > { %2363 = vmatprep.mubr.msk.bf16.mxu1 %vm2814_vm0, %v2813_v0  ;;  %2360 = vmatpush3.bf16.msra.mxu1 %v2543_v23  ;;  %v2547_v23 = vld [vmem:[#allocation10 + $0x10] sm:$0xff]  }
 0x327   : > { %2361 = vmatprep.subr.bf16.mxu1 %v2813_v0 }
 0x328   : > { %2354 = vmatpush3.bf16.msra.mxu0 %v2544_v24  ;;  %v2548_v24 = vld [vmem:[#allocation12 + $0x78] sm:$0xff]  }
 0x329   : > { %2367 = vmatprep.subr.bf16.mxu0 %v2813_v0 }
 0x32a   : > { %2362 = vmatpush3.bf16.msra.mxu1 %v2545_v25  ;;  %v2549_v25 = vld [vmem:[#allocation12 + $0x68] sm:$0xff]  }
 0x32b   : > { %2375 = vmatprep.subr.bf16.mxu1 %v2813_v0 }
 0x3d2   : > { %v865_v26 = vpop.f32.mrf.mxu0 }
 0x3d4   : > { %v2309_v27 = vpop.f32.mrf.mxu0 }
 0x3d5   : > { %v921_v28 = vpop.f32.mrf.mxu1  ;;  %v2551_v27 = vld [vmem:[#allocation12 + $0x60] sm:$0xff]  }
 0x3d6   : > { %v868_v29 = vpop.f32.mrf.mxu0  ;;  %v922_v4 = vadd.f32 %v921_v28, %v865_v26  ;;  %v2550_v26 = vld [vmem:[#allocation12 + $0x70] sm:$0xff]  }
 0x3d7   : > { %v2317_v30 = vpop.f32.mrf.mxu1 }
 0x3d8   : > { %v2310_v31 = vpop.f32.mrf.mxu0 }
 0x3d9   : > { %v924_v32 = vpop.f32.mrf.mxu1 }
 0x3da   : > { %v982_v33 = vpop.f32.mrf.mxu0  ;;  %v925_v5 = vadd.f32 %v924_v32, %v868_v29 }
 0x3db   : > { %v2318_v34 = vpop.f32.mrf.mxu1  ;;  %v989_v6 = vadd.f32 %v982_v33, %v922_v4 }
 0x3dc   : > { %v2325_v35 = vpop.f32.mrf.mxu0 }
 0x3dd   : > { %v1057_v36 = vpop.f32.mrf.mxu1  ;;  %v999_v10 = vadd.f32 %v2140_v7, %v989_v6  ;;  %v2555_v6 = vld [vmem:[#allocation12 + $0xa0] sm:$0xff]  }
 0x3de   : > { %v985_v37 = vpop.f32.mrf.mxu0 }
 0x3df   : > { %v2333_v38 = vpop.f32.mrf.mxu1  ;;  %v990_v8 = vadd.f32 %v985_v37, %v925_v5 }
 0x3e0   : > { %v2326_v39 = vpop.f32.mrf.mxu0  ;;  %v2168_v38 = vld [vmem:[%s3242_s9 + $0x5] sm:$0x1] }
 0x3e1   : > { %v1060_v40 = vpop.f32.mrf.mxu1  ;;  %v1000_v12 = vadd.f32 %v2140_v7, %v990_v8  ;;  %v2557_v8 = vld [vmem:[#allocation12 + $0xb8] sm:$0xff]  }
 0x3e2   : > { %v1110_v42 = vpop.f32.mrf.mxu0 }
 0x3e3   : > { %v2334_v43 = vpop.f32.mrf.mxu1  ;;  %v1111_v44 = vadd.f32 %v1110_v42, %v1057_v36 }
 0x3e4   : > { %v2341_v45 = vpop.f32.mrf.mxu0 }
 0x3e5   : > { %v1168_v46 = vpop.f32.mrf.mxu1 }
 0x3e6   : > { %v1113_v49 = vpop.f32.mrf.mxu0  ;;  %v1175_v53 = vadd.f32 %v1168_v46, %v1111_v44 }
 0x3e7   : > { %v2349_v54 = vpop.f32.mrf.mxu1  ;;  %v1114_v55 = vadd.f32 %v1113_v49, %v1060_v40 }
 0x3e8   : > { %v1185_v58 = vadd.f32 %v2151_v48, %v1175_v53  ;;  %v2342_v59 = vpop.f32.mrf.mxu0 }
 0x3e9   : > { %v1171_v60 = vpop.f32.mrf.mxu1 }
 0x3ea   : > { %v2152_v61 = vmul.f32 -1.442695, %v1185_v58  ;;  %v1176_v62 = vadd.f32 %v1171_v60, %v1114_v55  ;;  %v2552_v58 = vld [vmem:[#allocation12 + $0x88] sm:$0xff]  }
 0x3eb   : > { %v2350_v1 = vpop.f32.mrf.mxu1 }
 0x3ec   : > { %2572 = vpow2.f32 %v2152_v61  ;;  %v1186_v2 = vadd.f32 %v2151_v48, %v1176_v62  ;;  %v2553_v1 = vld [vmem:[#allocation12 + $0xa8] sm:$0xff]  }
 0x3ee   : > { %v2153_v3 = vmul.f32 -1.442695, %v1186_v2 }
 0x3f0   : > { %2574 = vpow2.f32 %v2153_v3  ;;  %v2554_v3 = vld [vmem:[#allocation12 + $0x80] sm:$0xff]  }
 0x3f1   : > { %2576 = vtanh.f32 %v999_v10  ;;  %v2560_v10 = vld [vmem:[%s3241_s8 + $0x38] sm:$0xff]  }
 0x3f9   : > { %v2573_v9 = vpop.eup %2572 }
 0x3fa   : > { %v1195_v11 = vadd.f32 1.0, %v2573_v9  ;;  %v2559_v9 = vld [vmem:[#allocation12 + $0xb0] sm:$0xff]  }
 0x3fc   : > { %2578 = vrcp.f32 %v1195_v11  ;;  %v2561_v11 = vld [vmem:[%s3241_s8 + $0x30] sm:$0xff]  }
 0x3fd   : > { %v2575_v13 = vpop.eup %2574  ;;  %2580 = vtanh.f32 %v1000_v12 }
 0x3fe   : > { %v1196_v14 = vadd.f32 1.0, %v2575_v13  ;;  %v2577_v15 = vpop.eup %2576 }
 0x400   : > { %2582 = vrcp.f32 %v1196_v14 }
 0x409   : > { %v2579_v16 = vpop.eup %2578 }
 0x40a   : > { %v2581_v17 = vpop.eup %2580  ;;  %v1201_v19 = vmul.f32 %v2579_v16, %v2577_v15 }
 0x40d   : > { %v2583_v18 = vpop.eup %2582 }
 0x40e   : > { %v1202_v20 = vmul.f32 %v2583_v18, %v2581_v17 }
 0x410   : > { %v1203_v22 = vpack.c.bf16 %v1202_v20, %v1201_v19 }
 0x412   : > { %2356 = vmatmul.mubr.msk.bf16.vlgmr.msra.gmra.mxu0 %vm595_vm1, %v1203_v22  ;;  %2364 = vmatmul.mubr.msk.bf16.vlgmr.msra.gmra.mxu1 %vm595_vm1, %v1203_v22 }
 0x413   : > { %2368 = vmatpush3.bf16.msra.mxu0 %v2546_v21  ;;  %2371 = vmatprep.mubr.msk.bf16.mxu0 %vm2814_vm0, %v2813_v0 }
 0x414   : > { %2369 = vmatprep.subr.bf16.mxu0 %v2813_v0  ;;  %2379 = vmatprep.mubr.msk.bf16.mxu1 %vm2814_vm0, %v2813_v0 }
 0x415   : > { %2376 = vmatpush3.bf16.msra.mxu1 %v2548_v24 }
 0x416   : > { %2377 = vmatprep.subr.bf16.mxu1 %v2813_v0 }
 0x417   : > { %2370 = vmatpush3.bf16.msra.mxu0 %v2547_v23 }
 0x418   : > { %2383 = vmatprep.subr.bf16.mxu0 %v2813_v0 }
 0x419   : > { %2378 = vmatpush3.bf16.msra.mxu1 %v2550_v26 }
 0x41a   : > { %2372 = vmatmul.mubr.msk.bf16.vlgmr.msra.gmra.mxu0 %vm595_vm1, %v3037_v41  ;;  %2391 = vmatprep.subr.bf16.mxu1 %v2813_v0  ;;  %v2155_v41 = vld [vmem:[%s3242_s9 + $0x3] ss:$0 sm:$0xff] }
 0x41b   : > { %2387 = vmatprep.mubr.msk.bf16.mxu0 %vm2814_vm0, %v2813_v0  ;;  %2384 = vmatpush3.bf16.msra.mxu0 %v2549_v25 }
 0x41c   : > { %2385 = vmatprep.subr.bf16.mxu0 %v2813_v0 }
 0x41f   : > { %2386 = vmatpush3.bf16.msra.mxu0 %v2551_v27 }
 0x420   : > { %2399 = vmatprep.subr.bf16.mxu0 %v2813_v0 }
 0x4d2   : > { %v1265_v28 = vpop.f32.mrf.mxu0  ;;  %v3143_v29 = vpop.f32.mrf.mxu1 }
 0x4d3   : > { %v1266_v32 = vadd.f32 %v2155_v41, %v1265_v28 }
 0x4d4   : > { %v2357_v30 = vpop.f32.mrf.mxu0  ;;  %v2365_v31 = vpop.f32.mrf.mxu1 }
 0x4d5   : > { %v1338_v39 = vadd.f32 %v1266_v32, %v574_v56  ;;  %v2193_v32 = vld [vmem:[%s3242_s9 + $0x7] ss:$0 sm:$0xff] }
 0x4d6   : > { %v1268_v33 = vpop.f32.mrf.mxu0  ;;  %v3145_v34 = vpop.f32.mrf.mxu1 }
 0x4d7   : > { %v1269_v35 = vadd.f32 %v2155_v41, %v1268_v33  ;;  %v1340_v45 = vmul.f32 0.70710677, %v1338_v39 }
 0x4d8   : > { %v2358_v36 = vpop.f32.mrf.mxu0  ;;  %v2366_v37 = vpop.f32.mrf.mxu1 }
 0x4d9   : > { %v1339_v40 = vadd.f32 %v1269_v35, %v575_v57 }
 0x4da   : > { %v1397_v42 = vpop.f32.mrf.mxu0 }
 0x4db   : > { %v1398_v43 = vadd.f32 %v2168_v38, %v1397_v42  ;;  %v1341_v46 = vmul.f32 0.70710677, %v1339_v40 }
 0x4dc   : > { %v2373_v44 = vpop.f32.mrf.mxu0 }
 0x4dd   : > { %v1406_v48 = vrot.slane %v1398_v43, %v782_v52 }
 0x4de   : > { %v1400_v49 = vpop.f32.mrf.mxu0 }
 0x4df   : > { %v1407_v53 = vadd.f32 %v1406_v48, %v1340_v45  ;;  %v1408_v54 = vadd.f32 %v1406_v48, %v1341_v46 }
 0x4e0   : > { %v2374_v50 = vpop.f32.mrf.mxu0 }
 0x4e1   : > { %v1411_v51 = vrot.slane %v1407_v53, 6  ;;  %v1412_v56 = vrot.slane %v1408_v54, 6  ;;  %v1420_v57 = vrot.slane %v1407_v53, 2  ;;  %v1421_v55 = vrot.slane %v1408_v54, 2 }
 0x4e2   : > { %v1427_v59 = vpack.c.bf16 %v1408_v54, %v1407_v53  ;;  %v2182_v54 = vld [vmem:[%s3242_s9 + $0x6] ss:$0 sm:$0xff] }
 0x4e3   : > { %v1415_v60 = vsel %vm1413_vm8, %v1412_v56, %v1411_v51  ;;  %v1414_v61 = vsel %vm1413_vm8, %v1411_v51, %v1412_v56  ;;  %v1424_v52 = vsel %vm1422_vm9, %v1421_v55, %v1420_v57  ;;  %v1423_v4 = vsel %vm1422_vm9, %v1420_v57, %v1421_v55 }
 0x4e4   : > { %2380 = vmatmul.mubr.msk.bf16.vlgmr.msra.gmra.mxu1 %vm595_vm1, %v1427_v59  ;;  %v1416_v62 = vsel %vm1409_vm10, %v1415_v60, 0.0  ;;  %v1426_v5 = vsel %vm1419_vm11, %v1424_v52, 0.0 }
 0x4e5   : > { %2392 = vmatpush3.bf16.msra.mxu1 %v2552_v58  ;;  %v1428_v2 = vpack.c.bf16 %v1414_v61, %v1416_v62  ;;  %2395 = vmatprep.mubr.msk.bf16.mxu1 %vm2814_vm0, %v2813_v0  ;;  %v1429_v7 = vpack.c.bf16 %v1426_v5, %v1423_v4  ;;  %v2562_v4 = vld [vmem:[%s3243_s10 + $0x8] sm:$0xff]   ;;  %v2563_v5 = vld [vmem:[%s3243_s10] sm:$0xff]  }
 0x4e6   : > { %2393 = vmatprep.subr.bf16.mxu1 %v2813_v0 }
 0x4e7   : > { %2388 = vmatmul.mubr.msk.bf16.vlgmr.msra.gmra.mxu0 %vm595_vm1, %v1428_v2 }
 0x4e8   : > { %2400 = vmatpush3.bf16.msra.mxu0 %v2553_v1  ;;  %2403 = vmatprep.mubr.msk.bf16.mxu0 %vm2814_vm0, %v2813_v0 }
 0x4e9   : > { %2394 = vmatpush3.bf16.msra.mxu1 %v2554_v3  ;;  %2401 = vmatprep.subr.bf16.mxu0 %v2813_v0 }
 0x4ea   : > { %2407 = vmatprep.subr.bf16.mxu1 %v2813_v0 }
 0x4ec   : > { %2396 = vmatmul.mubr.msk.bf16.vlgmr.msra.gmra.mxu1 %vm595_vm1, %v1429_v7  ;;  %2402 = vmatpush3.bf16.msra.mxu0 %v2555_v6  ;;  %v2201_v6 = vld [vmem:[%s3242_s9 + $0x9] ss:$0 sm:$0xff] }
 0x4ed   : > { %2408 = vmatpush3.bf16.msra.mxu1 %v2556_v63  ;;  %2415 = vmatprep.subr.bf16.mxu0 %v2813_v0 }
 0x4ee   : > { %2409 = vmatprep.subr.bf16.mxu1 %v2813_v0  ;;  %2411 = vmatprep.mubr.msk.bf16.mxu1 %vm2814_vm0, %v2813_v0 }
 0x4ef   : > { %2404 = vmatmul.mubr.msk.bf16.vlgmr.msra.gmra.mxu0 %vm595_vm1, %v1427_v59 }
 0x4f0   : > { %2416 = vmatpush3.bf16.msra.mxu0 %v2557_v8  ;;  %2419 = vmatprep.mubr.msk.bf16.mxu0 %vm2814_vm0, %v2813_v0 }
 0x4f1   : > { %2410 = vmatpush3.bf16.msra.mxu1 %v2558_v47  ;;  %2417 = vmatprep.subr.bf16.mxu0 %v2813_v0 }
 0x4f2   : > { %2423 = vmatprep.subr.bf16.mxu1 %v2813_v0 }
 0x4f4   : > { %2412 = vmatmul.mubr.msk.bf16.vlgmr.msra.gmra.mxu1 %vm595_vm1, %v1428_v2  ;;  %2418 = vmatpush3.bf16.msra.mxu0 %v2559_v9 }
 0x4f5   : > { %2427 = vmatprep.mubr.msk.bf16.mxu1 %vm2814_vm0, %v2813_v0  ;;  %2431 = vmatprep.subr.bf16.mxu0 %v2813_v0 }
 0x4f6   : > { %2424 = vmatpush3.bf16.msra.mxu1 %v2560_v10 }
 0x4f7   : > { %2420 = vmatmul.mubr.msk.bf16.vlgmr.msra.gmra.mxu0 %vm595_vm1, %v1429_v7  ;;  %2425 = vmatprep.subr.bf16.mxu1 %v2813_v0  ;;  %v2164_v7 = vld [vmem:[%s3242_s9 + $0x4] ss:$0 sm:$0xff] }
 0x4f8   : > { %2435 = vmatprep.mubr.msk.bf16.mxu0 %vm2814_vm0, %v2813_v0  ;;  %2432 = vmatpush3.bf16.msra.mxu0 %v2562_v4  ;;  %v1335_v10 = vadd.f32 %v2164_v7, %v3145_v34 }
 0x4f9   : > { %2433 = vmatprep.subr.bf16.mxu0 %v2813_v0  ;;  %v1332_v0 = vadd.f32 %v2164_v7, %v3143_v29 }
 0x4fa   : > { %2426 = vmatpush3.bf16.msra.mxu1 %v2561_v11 }
 0x4fc   : > { %2434 = vmatpush3.bf16.msra.mxu0 %v2563_v5 }
 0x5a4   : > { %v1489_v12 = vpop.f32.mrf.mxu1 }
 0x5a6   : > { %v2381_v13 = vpop.f32.mrf.mxu1 }
 0x5a7   : > { %v1545_v14 = vpop.f32.mrf.mxu0 }
 0x5a8   : > { %v1492_v15 = vpop.f32.mrf.mxu1  ;;  %v1546_v48 = vadd.f32 %v1545_v14, %v1489_v12 }
 0x5a9   : > { %v2389_v16 = vpop.f32.mrf.mxu0 }
 0x5aa   : > { %v2382_v17 = vpop.f32.mrf.mxu1  ;;  %v2205_v16 = vld [vmem:[%s3244_s11] ss:$0 sm:$0xff] }
 0x5ab   : > { %v1548_v18 = vpop.f32.mrf.mxu0 }
 0x5ac   : > { %v1606_v19 = vpop.f32.mrf.mxu1  ;;  %v1549_v49 = vadd.f32 %v1548_v18, %v1492_v15 }
 0x5ad   : > { %v2390_v20 = vpop.f32.mrf.mxu0  ;;  %v1613_v53 = vadd.f32 %v1606_v19, %v1546_v48 }
 0x5ae   : > { %v2397_v21 = vpop.f32.mrf.mxu1 }
 0x5af   : > { %v1681_v22 = vpop.f32.mrf.mxu0  ;;  %v1623_v56 = vadd.f32 %v2182_v54, %v1613_v53 }
 0x5b0   : > { %v1609_v23 = vpop.f32.mrf.mxu1 }
 0x5b1   : > { %v2405_v24 = vpop.f32.mrf.mxu0  ;;  %v1614_v50 = vadd.f32 %v1609_v23, %v1549_v49 }
 0x5b2   : > { %v2398_v25 = vpop.f32.mrf.mxu1 }
 0x5b3   : > { %v1684_v26 = vpop.f32.mrf.mxu0  ;;  %v1624_v55 = vadd.f32 %v2182_v54, %v1614_v50 }
 0x5b4   : > { %v1734_v27 = vpop.f32.mrf.mxu1 }
 0x5b5   : > { %v2406_v41 = vpop.f32.mrf.mxu0  ;;  %v1735_v28 = vadd.f32 %v1734_v27, %v1681_v22 }
 0x5b6   : > { %v2413_v30 = vpop.f32.mrf.mxu1 }
 0x5b7   : > { %v1792_v31 = vpop.f32.mrf.mxu0 }
 0x5b8   : > { %v1737_v33 = vpop.f32.mrf.mxu1  ;;  %v1799_v35 = vadd.f32 %v1792_v31, %v1735_v28 }
 0x5b9   : > { %v2421_v36 = vpop.f32.mrf.mxu0  ;;  %v1738_v37 = vadd.f32 %v1737_v33, %v1684_v26 }
 0x5ba   : > { %v1809_v38 = vadd.f32 %v2193_v32, %v1799_v35  ;;  %v2414_v39 = vpop.f32.mrf.mxu1 }
 0x5bb   : > { %v1795_v40 = vpop.f32.mrf.mxu0 }
 0x5bc   : > { %v2194_v42 = vmul.f32 -1.442695, %v1809_v38  ;;  %v1800_v43 = vadd.f32 %v1795_v40, %v1738_v37 }
 0x5bd   : > { %v2422_v44 = vpop.f32.mrf.mxu0 }
 0x5be   : > { %2584 = vpow2.f32 %v2194_v42  ;;  %v1810_v45 = vadd.f32 %v2193_v32, %v1800_v43 }
 0x5c0   : > { %v2195_v46 = vmul.f32 -1.442695, %v1810_v45 }
 0x5c2   : > { %2586 = vpow2.f32 %v2195_v46 }
 0x5c3   : > { %2588 = vtanh.f32 %v1623_v56 }
 0x5cb   : > { %v2585_v51 = vpop.eup %2584 }
 0x5cc   : > { %v1819_v57 = vadd.f32 1.0, %v2585_v51 }
 0x5ce   : > { %2590 = vrcp.f32 %v1819_v57 }
 0x5cf   : > { %v2587_v58 = vpop.eup %2586  ;;  %2592 = vtanh.f32 %v1624_v55 }
 0x5d0   : > { %v1820_v59 = vadd.f32 1.0, %v2587_v58  ;;  %v2589_v60 = vpop.eup %2588 }
 0x5d2   : > { %2594 = vrcp.f32 %v1820_v59 }
 0x5db   : > { %v2591_v61 = vpop.eup %2590 }
 0x5dc   : > { %v2593_v52 = vpop.eup %2592  ;;  %v1825_v1 = vmul.f32 %v2591_v61, %v2589_v60 }
 0x5df   : > { %v2595_v62 = vpop.eup %2594 }
 0x5e0   : > { %v1826_v2 = vmul.f32 %v2595_v62, %v2593_v52 }
 0x5e2   : > { %v1827_v3 = vpack.c.bf16 %v1826_v2, %v1825_v1 }
 0x5e4   : > { %2428 = vmatmul.mubr.msk.bf16.vlgmr.msra.gmra.mxu1 %vm595_vm1, %v1827_v3 }
 0x6a4   : > { %v1890_v63 = vpop.f32.mrf.mxu1 }
 0x6a5   : > { %v1891_v47 = vadd.f32 %v2201_v6, %v1890_v63 }
 0x6a6   : > { %v2429_v8 = vpop.f32.mrf.mxu1 }
 0x6a7   : > { %v1897_v13 = vadd.f32 %v1891_v47, %v1332_v0 }
 0x6a8   : > { %v1893_v9 = vpop.f32.mrf.mxu1 }
 0x6a9   : > { %v1894_v11 = vadd.f32 %v2201_v6, %v1893_v9 }
 0x6aa   : > { %v2430_v12 = vpop.f32.mrf.mxu1 }
 0x6ab   : > { %v1898_v14 = vadd.f32 %v1894_v11, %v1335_v10 }
 0x6ad   : > { %v1903_v15 = vpack.c.bf16 %v1898_v14, %v1897_v13 }
 0x6af   : > { %2436 = vmatmul.mubr.msk.bf16.vlgmr.msra.gmra.mxu0 %vm595_vm1, %v1903_v15 }
 0x76f   : > { %v1960_v17 = vpop.f32.mrf.mxu0 }
 0x770   : > { %v1961_v29 = vadd.f32 %v2205_v16, %v1960_v17 }
 0x771   : > { %v2437_v18 = vpop.f32.mrf.mxu0 }
 0x772   : > { %1967 = vst.msk [vmem:[%s511_s28] sm:$0xff] %vm525_vm3, %v1961_v29 }
 0x773   : > { %v1963_v34 = vpop.f32.mrf.mxu0 }
 0x774   : > { %v1964_v19 = vadd.f32 %v2205_v16, %v1963_v34 }
 0x775   : > { %v2438_v20 = vpop.f32.mrf.mxu0 }
 0x776   : > { %1968 = vst.msk [vmem:[%s511_s28 + $0x8] sm:$0xff] %vm525_vm3, %v1964_v19 }
 0x777 PF: > { %s26_s21 = sadd.s32 1, %s2800_s21  }
 0x778   : > { %p23_p13 = scmp.ge.s32.totalorder %s26_s21, 4  }
 0x77a   :  { %25 = sbr.rel (!%p23_p13) target bundleno = 4 (0x4), region = 151 }
 0x77f   :  { %1991 = vsyncpa [#allocation3], 1 }
 0x780   :  { %1993 = vsyncpa [#allocation3 + $0x1], 1 }
 0x781   :  { %1994 = vsyncpa [#allocation5], 1 }
 0x782   :  { %1995 = vsyncpa [#allocation8], 1 }
 0x783   :  { %1996 = vsyncpa [#allocation11], 1 }

</bundles_post_ra>
